<compile_context>
chip_gen: v7x
topology: tpu7x:2x2x1
jax: 0.10.0
libtpu: 0.0.40
codegen_flags: <defaults>
</compile_context>

<pallas_src>
import functools
import math

import jax
import jax.numpy as jnp
from jax import lax
from jax.experimental import pallas as pl
from jax.experimental.pallas import tpu as pltpu


def _round_up(x, m):
    return ((x + m - 1) // m) * m


def _gru_npn_kernel(emb_ref, h0_ref, wih_ref, bx_ref, whh_ref, bhn_ref,
                    wm_ref, ws_ref, bm_ref, bs_ref,
                    om_ref, os_ref, xp_sc, hs_sc, *, T, B, H):
    """Whole sequence in one invocation.

    emb_ref : (T*B, E)      embedded tokens (batch padded to B)
    h0_ref  : (B, H)        initial hidden state
    wih_ref : (E, Gp)       fused+padded W_ih  (gate order r,z,n)
    bx_ref  : (1, Gp)       fused input bias:  [b_ih_r+b_hh_r, b_ih_z+b_hh_z, b_ih_n]
    whh_ref : (H, Gp)       fused+padded W_hh
    bhn_ref : (1, H)        b_hh for the n gate (applied inside r*(...))
    wm/ws   : (H, Op)       NPN mean / (softplus'ed) variance weights, lane-padded
    bm/bs   : (1, Op)
    om/os   : (T*B, Op)     lane-dense outputs
    xp_sc   : (T*B, Gp)     VMEM scratch: precomputed input projections
    hs_sc   : (T*B, H)      VMEM scratch: collected hidden states
    """
    # ---- Prologue: batched input projection for all timesteps (off the
    #      serial path). Biases for r/z already include b_hh. ----
    xp_sc[...] = (jnp.dot(emb_ref[...], wih_ref[...],
                          preferred_element_type=jnp.float32) + bx_ref[...])

    whh = whh_ref[...]
    bhn = bhn_ref[...]

    # ---- Serial GRU recurrence: only h @ W_hh_fused is on the critical path.
    def step(t, h):
        row = pl.multiple_of(t * B, B)
        xp = xp_sc[pl.ds(row, B), :]                                # (B, Gp)
        hp = jnp.dot(h, whh, preferred_element_type=jnp.float32)    # (B, Gp)
        r = jax.nn.sigmoid(xp[:, 0:H] + hp[:, 0:H])
        z = jax.nn.sigmoid(xp[:, H:2 * H] + hp[:, H:2 * H])
        n = jnp.tanh(xp[:, 2 * H:3 * H] + r * (hp[:, 2 * H:3 * H] + bhn))
        h_new = (1.0 - z) * n + z * h
        hs_sc[pl.ds(row, B), :] = h_new
        return h_new

    lax.fori_loop(0, T, step, h0_ref[...], unroll=True)

    # ---- Epilogue: NPN decoder as one batched pass over all hidden states.
    hs = hs_sc[...]                                                 # (T*B, H)
    o_m = jnp.dot(hs, wm_ref[...], preferred_element_type=jnp.float32) + bm_ref[...]
    o_s = jnp.dot(hs * hs, ws_ref[...], preferred_element_type=jnp.float32) + bs_ref[...]

    zeta_sq = jnp.float32(math.pi / 8.0)
    alpha = jnp.float32(4.0 - 2.0 * math.sqrt(2.0))
    beta = jnp.float32(-math.log(math.sqrt(2.0) + 1.0))
    a_m = jax.nn.sigmoid(o_m * lax.rsqrt(1.0 + zeta_sq * o_s))
    a_s = jax.nn.sigmoid(alpha * (o_m + beta) *
                         lax.rsqrt(1.0 + zeta_sq * alpha * alpha * o_s)) - a_m * a_m

    om_ref[...] = a_m
    os_ref[...] = a_s


def gru_npn_forward(tokens, h0, params):
    (emb_table, w_ih, w_hh, b_ih, b_hh, w_m, w_s_raw, b_m, b_s_raw) = params
    T, B = tokens.shape
    E = emb_table.shape[1]
    H = w_hh.shape[-1]
    O = w_m.shape[-1]

    B_pad = _round_up(B, 8)          # sublane-friendly batch
    G = 3 * H
    G_pad = _round_up(G, 128)        # lane-friendly fused-gate width
    O_pad = _round_up(O, 128)        # lane-dense output width
    TB = T * B_pad

    # ---- XLA glue: embedding gather, parameter fusion / padding, softplus. --
    # TODO(synk): embedding gather could move in-kernel via scalar-prefetched
    # token ids + pl.Element row gather for large vocab/seq; kept in XLA here.
    emb = emb_table[tokens]                                      # (T, B, E)
    emb = jnp.pad(emb, ((0, 0), (0, B_pad - B), (0, 0)))
    emb2d = emb.reshape(TB, E)
    h0p = jnp.pad(h0.reshape(B, H), ((0, B_pad - B), (0, 0)))

    w_ih_f = jnp.pad(jnp.concatenate([w_ih[0], w_ih[1], w_ih[2]], axis=1),
                     ((0, 0), (0, G_pad - G)))
    w_hh_f = jnp.pad(jnp.concatenate([w_hh[0], w_hh[1], w_hh[2]], axis=1),
                     ((0, 0), (0, G_pad - G)))
    bx = jnp.pad(jnp.concatenate([b_ih[0] + b_hh[0],
                                  b_ih[1] + b_hh[1],
                                  b_ih[2]], axis=1),
                 ((0, 0), (0, G_pad - G)))
    bhn = b_hh[2]                                                # (1, H)

    w_s = jax.nn.softplus(w_s_raw)
    b_s = jax.nn.softplus(b_s_raw)
    wm_p = jnp.pad(w_m, ((0, 0), (0, O_pad - O)))
    ws_p = jnp.pad(w_s, ((0, 0), (0, O_pad - O)))
    bm_p = jnp.pad(b_m, ((0, 0), (0, O_pad - O)))
    bs_p = jnp.pad(b_s, ((0, 0), (0, O_pad - O)))

    kernel = functools.partial(_gru_npn_kernel, T=T, B=B_pad, H=H)

    out_m, out_s = pl.pallas_call(
        kernel,
        out_shape=(jax.ShapeDtypeStruct((TB, O_pad), jnp.float32),
                   jax.ShapeDtypeStruct((TB, O_pad), jnp.float32)),
        grid=(1,),
        in_specs=[
            pl.BlockSpec((TB, E), lambda i: (0, 0)),        # emb (all timesteps)
            pl.BlockSpec((B_pad, H), lambda i: (0, 0)),     # h0
            pl.BlockSpec((E, G_pad), lambda i: (0, 0)),     # fused W_ih
            pl.BlockSpec((1, G_pad), lambda i: (0, 0)),     # fused input bias
            pl.BlockSpec((H, G_pad), lambda i: (0, 0)),     # fused W_hh
            pl.BlockSpec((1, H), lambda i: (0, 0)),         # b_hh (n gate)
            pl.BlockSpec((H, O_pad), lambda i: (0, 0)),     # NPN W_m
            pl.BlockSpec((H, O_pad), lambda i: (0, 0)),     # NPN W_s
            pl.BlockSpec((1, O_pad), lambda i: (0, 0)),     # NPN b_m
            pl.BlockSpec((1, O_pad), lambda i: (0, 0)),     # NPN b_s
        ],
        out_specs=(
            pl.BlockSpec((TB, O_pad), lambda i: (0, 0)),    # out mean (lane-dense)
            pl.BlockSpec((TB, O_pad), lambda i: (0, 0)),    # out variance
        ),
        scratch_shapes=[
            pltpu.VMEM((TB, G_pad), jnp.float32),           # input projections
            pltpu.VMEM((TB, H), jnp.float32),               # hidden states
        ],
        compiler_params=pltpu.CompilerParams(
            dimension_semantics=("arbitrary",)),
    )(emb2d, h0p, w_ih_f, bx, w_hh_f, bhn, wm_p, ws_p, bm_p, bs_p)

    out_m = out_m.reshape(T, B_pad, O_pad)[:, :B, :O]
    out_s = out_s.reshape(T, B_pad, O_pad)[:, :B, :O]
    return out_m, out_s


def gru_npn_reference(tokens, h0, params):
    """Pure-JAX reference (same math) for a correctness check."""
    (emb_table, w_ih, w_hh, b_ih, b_hh, w_m, w_s_raw, b_m, b_s_raw) = params
    emb = emb_table[tokens]
    w_s = jax.nn.softplus(w_s_raw)
    b_s = jax.nn.softplus(b_s_raw)

    def cell(h, x):
        i_r = x @ w_ih[0] + b_ih[0]
        i_z = x @ w_ih[1] + b_ih[1]
        i_n = x @ w_ih[2] + b_ih[2]
        h_r = h @ w_hh[0] + b_hh[0]
        h_z = h @ w_hh[1] + b_hh[1]
        h_n = h @ w_hh[2] + b_hh[2]
        r = jax.nn.sigmoid(i_r + h_r)
        z = jax.nn.sigmoid(i_z + h_z)
        n = jnp.tanh(i_n + r * h_n)
        h_new = (1.0 - z) * n + z * h
        return h_new, h_new

    _, hs = lax.scan(cell, h0.reshape(h0.shape[-2], h0.shape[-1]), emb)
    o_m = hs @ w_m + b_m
    o_s = (hs * hs) @ w_s + b_s
    zeta_sq = math.pi / 8.0
    alpha = 4.0 - 2.0 * math.sqrt(2.0)
    beta = -math.log(math.sqrt(2.0) + 1.0)
    a_m = jax.nn.sigmoid(o_m / jnp.sqrt(1.0 + zeta_sq * o_s))
    a_s = jax.nn.sigmoid(alpha * (o_m + beta) /
                         jnp.sqrt(1.0 + zeta_sq * alpha * alpha * o_s)) - a_m * a_m
    return a_m, a_s


def init_params(key, vocab_sz, emb_sz, hidden_sz, output_sz):
    ks = jax.random.split(key, 9)
    kg = 1.0 / math.sqrt(hidden_sz)
    kd = 1.0 / math.sqrt(hidden_sz)
    u = lambda k, shape, a: jax.random.uniform(k, shape, jnp.float32, -a, a)
    emb_table = jax.random.normal(ks[0], (vocab_sz, emb_sz), jnp.float32)
    w_ih = u(ks[1], (3, emb_sz, hidden_sz), kg)
    w_hh = u(ks[2], (3, hidden_sz, hidden_sz), kg)
    b_ih = u(ks[3], (3, 1, hidden_sz), kg)
    b_hh = u(ks[4], (3, 1, hidden_sz), kg)
    w_m = u(ks[5], (hidden_sz, output_sz), kd)
    w_s_raw = u(ks[6], (hidden_sz, output_sz), kd)
    b_m = u(ks[7], (1, output_sz), kd)
    b_s_raw = u(ks[8], (1, output_sz), kd)
    return (emb_table, w_ih, w_hh, b_ih, b_hh, w_m, w_s_raw, b_m, b_s_raw)


if __name__ == "__main__":
    VOCAB, EMB, HID, OUT = 64, 32, 32, 16
    T, B = 8, 4

    key = jax.random.PRNGKey(0)
    kp, kt = jax.random.split(key)
    params = init_params(kp, VOCAB, EMB, HID, OUT)
    tokens = jax.random.randint(kt, (T, B), 0, VOCAB, dtype=jnp.int32)
    h0 = jnp.zeros((1, B, HID), jnp.float32)          # init_hidden(batch_sz)

    out_m, out_s = jax.jit(gru_npn_forward)(tokens, h0, params)
    jax.block_until_ready((out_m, out_s))

    ref_m, ref_s = gru_npn_reference(tokens, h0, params)
    assert out_m.shape == (T, B, OUT) and out_s.shape == (T, B, OUT)
    assert jnp.allclose(out_m, ref_m, atol=2e-3, rtol=2e-3)
    assert jnp.allclose(out_s, ref_s, atol=2e-3, rtol=2e-3)

    print("KERNEL_OK")
</pallas_src>

<mosaic_0001>
module attributes {stable_mosaic.version = 11 : i64} {
  func.func @_gru_npn_kernel(%arg0: i32, %arg1: memref<64x32xf32, #tpu.memory_space<vmem>>, %arg2: memref<8x32xf32, #tpu.memory_space<vmem>>, %arg3: memref<32x128xf32, #tpu.memory_space<vmem>>, %arg4: memref<1x128xf32, #tpu.memory_space<vmem>>, %arg5: memref<32x128xf32, #tpu.memory_space<vmem>>, %arg6: memref<1x32xf32, #tpu.memory_space<vmem>>, %arg7: memref<32x128xf32, #tpu.memory_space<vmem>>, %arg8: memref<32x128xf32, #tpu.memory_space<vmem>>, %arg9: memref<1x128xf32, #tpu.memory_space<vmem>>, %arg10: memref<1x128xf32, #tpu.memory_space<vmem>>, %arg11: memref<64x128xf32, #tpu.memory_space<vmem>>, %arg12: memref<64x128xf32, #tpu.memory_space<vmem>>, %arg13: memref<64x128xf32, #tpu.memory_space<vmem>>, %arg14: memref<64x32xf32, #tpu.memory_space<vmem>>) attributes {dimension_semantics = [#tpu.dimension_semantics<arbitrary>], iteration_bounds = array<i64: 1>, scalar_prefetch = 0 : i64, scratch_operands = 2 : i64, tpu.core_type = #tpu.core_type<tc>, window_params = [{pipeline_mode = #tpu.pipeline_mode<synchronous>, transform_indices = @transform_0, window_bounds = array<i64: 64, 32>}, {pipeline_mode = #tpu.pipeline_mode<synchronous>, transform_indices = @transform_1, window_bounds = array<i64: 8, 32>}, {pipeline_mode = #tpu.pipeline_mode<synchronous>, transform_indices = @transform_2, window_bounds = array<i64: 32, 128>}, {pipeline_mode = #tpu.pipeline_mode<synchronous>, transform_indices = @transform_3, window_bounds = array<i64: 1, 128>}, {pipeline_mode = #tpu.pipeline_mode<synchronous>, transform_indices = @transform_4, window_bounds = array<i64: 32, 128>}, {pipeline_mode = #tpu.pipeline_mode<synchronous>, transform_indices = @transform_5, window_bounds = array<i64: 1, 32>}, {pipeline_mode = #tpu.pipeline_mode<synchronous>, transform_indices = @transform_6, window_bounds = array<i64: 32, 128>}, {pipeline_mode = #tpu.pipeline_mode<synchronous>, transform_indices = @transform_7, window_bounds = array<i64: 32, 128>}, {pipeline_mode = #tpu.pipeline_mode<synchronous>, transform_indices = @transform_8, window_bounds = array<i64: 1, 128>}, {pipeline_mode = #tpu.pipeline_mode<synchronous>, transform_indices = @transform_9, window_bounds = array<i64: 1, 128>}, {pipeline_mode = #tpu.pipeline_mode<synchronous>, transform_indices = @transform_10, window_bounds = array<i64: 64, 128>}, {pipeline_mode = #tpu.pipeline_mode<synchronous>, transform_indices = @transform_11, window_bounds = array<i64: 64, 128>}]} {
    %c0 = arith.constant 0 : index
    %c0_0 = arith.constant 0 : index
    %0 = vector.load %arg1[%c0, %c0_0] : memref<64x32xf32, #tpu.memory_space<vmem>>, vector<64x32xf32>
    %c0_1 = arith.constant 0 : index
    %c0_2 = arith.constant 0 : index
    %1 = vector.load %arg3[%c0_1, %c0_2] : memref<32x128xf32, #tpu.memory_space<vmem>>, vector<32x128xf32>
    %cst = arith.constant dense<0.000000e+00> : vector<64x128xf32>
    %2 = tpu.matmul %0, %1, %cst {dimension_numbers = #tpu.dot_dimension_numbers<[1], [0], [0], [1], [0, 0, 1, 1], [], []>} : vector<64x32xf32>, vector<32x128xf32>, vector<64x128xf32> -> vector<64x128xf32>
    %c0_3 = arith.constant 0 : index
    %c0_4 = arith.constant 0 : index
    %3 = vector.load %arg4[%c0_3, %c0_4] : memref<1x128xf32, #tpu.memory_space<vmem>>, vector<1x128xf32>
    %4 = vector.broadcast %3 : vector<1x128xf32> to vector<64x128xf32>
    %5 = arith.addf %2, %4 : vector<64x128xf32>
    %c0_5 = arith.constant 0 : index
    %c0_6 = arith.constant 0 : index
    %6 = vector.load %arg13[%c0_5, %c0_6] : memref<64x128xf32, #tpu.memory_space<vmem>>, vector<64x128xf32>
    tpu.vector_store %arg13[%c0_5, %c0_6], %5 {strides = array<i32>} : memref<64x128xf32, #tpu.memory_space<vmem>>, vector<64x128xf32>,
    %c0_7 = arith.constant 0 : index
    %c0_8 = arith.constant 0 : index
    %7 = vector.load %arg5[%c0_7, %c0_8] : memref<32x128xf32, #tpu.memory_space<vmem>>, vector<32x128xf32>
    %c0_9 = arith.constant 0 : index
    %c0_10 = arith.constant 0 : index
    %8 = vector.load %arg6[%c0_9, %c0_10] : memref<1x32xf32, #tpu.memory_space<vmem>>, vector<1x32xf32>
    %c0_11 = arith.constant 0 : index
    %c0_12 = arith.constant 0 : index
    %9 = vector.load %arg2[%c0_11, %c0_12] : memref<8x32xf32, #tpu.memory_space<vmem>>, vector<8x32xf32>
    %c0_i32 = arith.constant 0 : i32
    %c8_i32 = arith.constant 8 : i32
    %10 = arith.muli %c0_i32, %c8_i32 : i32
    %11 = tpu.assume_multiple %10, 8 : i32
    %12 = arith.index_cast %11 : i32 to index
    %c0_13 = arith.constant 0 : index
    %13 = vector.load %arg13[%12, %c0_13] : memref<64x128xf32, #tpu.memory_space<vmem>>, vector<8x128xf32>
    %cst_14 = arith.constant dense<0.000000e+00> : vector<8x128xf32>
    %14 = tpu.matmul %9, %7, %cst_14 {dimension_numbers = #tpu.dot_dimension_numbers<[1], [0], [0], [1], [0, 0, 1, 1], [], []>} : vector<8x32xf32>, vector<32x128xf32>, vector<8x128xf32> -> vector<8x128xf32>
    %15 = vector.extract_strided_slice %13 {offsets = [0, 0], sizes = [8, 32], strides = [1, 1]} : vector<8x128xf32> to vector<8x32xf32>
    %16 = vector.extract_strided_slice %14 {offsets = [0, 0], sizes = [8, 32], strides = [1, 1]} : vector<8x128xf32> to vector<8x32xf32>
    %17 = arith.addf %15, %16 : vector<8x32xf32>
    %18 = arith.negf %17 : vector<8x32xf32>
    %19 = math.exp %18 : vector<8x32xf32>
    %cst_15 = arith.constant 1.000000e+00 : f32
    %20 = vector.broadcast %cst_15 : f32 to vector<8x32xf32>
    %21 = arith.addf %20, %19 : vector<8x32xf32>
    %22 = arith.divf %20, %21 : vector<8x32xf32>
    %23 = vector.extract_strided_slice %13 {offsets = [0, 32], sizes = [8, 32], strides = [1, 1]} : vector<8x128xf32> to vector<8x32xf32>
    %24 = vector.extract_strided_slice %14 {offsets = [0, 32], sizes = [8, 32], strides = [1, 1]} : vector<8x128xf32> to vector<8x32xf32>
    %25 = arith.addf %23, %24 : vector<8x32xf32>
    %26 = arith.negf %25 : vector<8x32xf32>
    %27 = math.exp %26 : vector<8x32xf32>
    %cst_16 = arith.constant 1.000000e+00 : f32
    %28 = vector.broadcast %cst_16 : f32 to vector<8x32xf32>
    %29 = arith.addf %28, %27 : vector<8x32xf32>
    %30 = arith.divf %28, %29 : vector<8x32xf32>
    %31 = vector.extract_strided_slice %13 {offsets = [0, 64], sizes = [8, 32], strides = [1, 1]} : vector<8x128xf32> to vector<8x32xf32>
    %32 = vector.extract_strided_slice %14 {offsets = [0, 64], sizes = [8, 32], strides = [1, 1]} : vector<8x128xf32> to vector<8x32xf32>
    %33 = vector.broadcast %8 : vector<1x32xf32> to vector<8x32xf32>
    %34 = arith.addf %32, %33 : vector<8x32xf32>
    %35 = arith.mulf %22, %34 : vector<8x32xf32>
    %36 = arith.addf %31, %35 : vector<8x32xf32>
    %37 = math.tanh %36 : vector<8x32xf32>
    %cst_17 = arith.constant 1.000000e+00 : f32
    %38 = vector.broadcast %cst_17 : f32 to vector<8x32xf32>
    %39 = arith.subf %38, %30 : vector<8x32xf32>
    %40 = arith.mulf %39, %37 : vector<8x32xf32>
    %41 = arith.mulf %30, %9 : vector<8x32xf32>
    %42 = arith.addf %40, %41 : vector<8x32xf32>
    %43 = arith.index_cast %11 : i32 to index
    %c0_18 = arith.constant 0 : index
    %44 = vector.load %arg14[%43, %c0_18] : memref<64x32xf32, #tpu.memory_space<vmem>>, vector<8x32xf32>
    tpu.vector_store %arg14[%43, %c0_18], %42 {strides = array<i32>} : memref<64x32xf32, #tpu.memory_space<vmem>>, vector<8x32xf32>,
    %c1_i32 = arith.constant 1 : i32
    %c8_i32_19 = arith.constant 8 : i32
    %45 = arith.muli %c1_i32, %c8_i32_19 : i32
    %46 = tpu.assume_multiple %45, 8 : i32
    %47 = arith.index_cast %46 : i32 to index
    %c0_20 = arith.constant 0 : index
    %48 = vector.load %arg13[%47, %c0_20] : memref<64x128xf32, #tpu.memory_space<vmem>>, vector<8x128xf32>
    %cst_21 = arith.constant dense<0.000000e+00> : vector<8x128xf32>
    %49 = tpu.matmul %42, %7, %cst_21 {dimension_numbers = #tpu.dot_dimension_numbers<[1], [0], [0], [1], [0, 0, 1, 1], [], []>} : vector<8x32xf32>, vector<32x128xf32>, vector<8x128xf32> -> vector<8x128xf32>
    %50 = vector.extract_strided_slice %48 {offsets = [0, 0], sizes = [8, 32], strides = [1, 1]} : vector<8x128xf32> to vector<8x32xf32>
    %51 = vector.extract_strided_slice %49 {offsets = [0, 0], sizes = [8, 32], strides = [1, 1]} : vector<8x128xf32> to vector<8x32xf32>
    %52 = arith.addf %50, %51 : vector<8x32xf32>
    %53 = arith.negf %52 : vector<8x32xf32>
    %54 = math.exp %53 : vector<8x32xf32>
    %cst_22 = arith.constant 1.000000e+00 : f32
    %55 = vector.broadcast %cst_22 : f32 to vector<8x32xf32>
    %56 = arith.addf %55, %54 : vector<8x32xf32>
    %57 = arith.divf %55, %56 : vector<8x32xf32>
    %58 = vector.extract_strided_slice %48 {offsets = [0, 32], sizes = [8, 32], strides = [1, 1]} : vector<8x128xf32> to vector<8x32xf32>
    %59 = vector.extract_strided_slice %49 {offsets = [0, 32], sizes = [8, 32], strides = [1, 1]} : vector<8x128xf32> to vector<8x32xf32>
    %60 = arith.addf %58, %59 : vector<8x32xf32>
    %61 = arith.negf %60 : vector<8x32xf32>
    %62 = math.exp %61 : vector<8x32xf32>
    %cst_23 = arith.constant 1.000000e+00 : f32
    %63 = vector.broadcast %cst_23 : f32 to vector<8x32xf32>
    %64 = arith.addf %63, %62 : vector<8x32xf32>
    %65 = arith.divf %63, %64 : vector<8x32xf32>
    %66 = vector.extract_strided_slice %48 {offsets = [0, 64], sizes = [8, 32], strides = [1, 1]} : vector<8x128xf32> to vector<8x32xf32>
    %67 = vector.extract_strided_slice %49 {offsets = [0, 64], sizes = [8, 32], strides = [1, 1]} : vector<8x128xf32> to vector<8x32xf32>
    %68 = vector.broadcast %8 : vector<1x32xf32> to vector<8x32xf32>
    %69 = arith.addf %67, %68 : vector<8x32xf32>
    %70 = arith.mulf %57, %69 : vector<8x32xf32>
    %71 = arith.addf %66, %70 : vector<8x32xf32>
    %72 = math.tanh %71 : vector<8x32xf32>
    %cst_24 = arith.constant 1.000000e+00 : f32
    %73 = vector.broadcast %cst_24 : f32 to vector<8x32xf32>
    %74 = arith.subf %73, %65 : vector<8x32xf32>
    %75 = arith.mulf %74, %72 : vector<8x32xf32>
    %76 = arith.mulf %65, %42 : vector<8x32xf32>
    %77 = arith.addf %75, %76 : vector<8x32xf32>
    %78 = arith.index_cast %46 : i32 to index
    %c0_25 = arith.constant 0 : index
    %79 = vector.load %arg14[%78, %c0_25] : memref<64x32xf32, #tpu.memory_space<vmem>>, vector<8x32xf32>
    tpu.vector_store %arg14[%78, %c0_25], %77 {strides = array<i32>} : memref<64x32xf32, #tpu.memory_space<vmem>>, vector<8x32xf32>,
    %c2_i32 = arith.constant 2 : i32
    %c8_i32_26 = arith.constant 8 : i32
    %80 = arith.muli %c2_i32, %c8_i32_26 : i32
    %81 = tpu.assume_multiple %80, 8 : i32
    %82 = arith.index_cast %81 : i32 to index
    %c0_27 = arith.constant 0 : index
    %83 = vector.load %arg13[%82, %c0_27] : memref<64x128xf32, #tpu.memory_space<vmem>>, vector<8x128xf32>
    %cst_28 = arith.constant dense<0.000000e+00> : vector<8x128xf32>
    %84 = tpu.matmul %77, %7, %cst_28 {dimension_numbers = #tpu.dot_dimension_numbers<[1], [0], [0], [1], [0, 0, 1, 1], [], []>} : vector<8x32xf32>, vector<32x128xf32>, vector<8x128xf32> -> vector<8x128xf32>
    %85 = vector.extract_strided_slice %83 {offsets = [0, 0], sizes = [8, 32], strides = [1, 1]} : vector<8x128xf32> to vector<8x32xf32>
    %86 = vector.extract_strided_slice %84 {offsets = [0, 0], sizes = [8, 32], strides = [1, 1]} : vector<8x128xf32> to vector<8x32xf32>
    %87 = arith.addf %85, %86 : vector<8x32xf32>
    %88 = arith.negf %87 : vector<8x32xf32>
    %89 = math.exp %88 : vector<8x32xf32>
    %cst_29 = arith.constant 1.000000e+00 : f32
    %90 = vector.broadcast %cst_29 : f32 to vector<8x32xf32>
    %91 = arith.addf %90, %89 : vector<8x32xf32>
    %92 = arith.divf %90, %91 : vector<8x32xf32>
    %93 = vector.extract_strided_slice %83 {offsets = [0, 32], sizes = [8, 32], strides = [1, 1]} : vector<8x128xf32> to vector<8x32xf32>
    %94 = vector.extract_strided_slice %84 {offsets = [0, 32], sizes = [8, 32], strides = [1, 1]} : vector<8x128xf32> to vector<8x32xf32>
    %95 = arith.addf %93, %94 : vector<8x32xf32>
    %96 = arith.negf %95 : vector<8x32xf32>
    %97 = math.exp %96 : vector<8x32xf32>
    %cst_30 = arith.constant 1.000000e+00 : f32
    %98 = vector.broadcast %cst_30 : f32 to vector<8x32xf32>
    %99 = arith.addf %98, %97 : vector<8x32xf32>
    %100 = arith.divf %98, %99 : vector<8x32xf32>
    %101 = vector.extract_strided_slice %83 {offsets = [0, 64], sizes = [8, 32], strides = [1, 1]} : vector<8x128xf32> to vector<8x32xf32>
    %102 = vector.extract_strided_slice %84 {offsets = [0, 64], sizes = [8, 32], strides = [1, 1]} : vector<8x128xf32> to vector<8x32xf32>
    %103 = vector.broadcast %8 : vector<1x32xf32> to vector<8x32xf32>
    %104 = arith.addf %102, %103 : vector<8x32xf32>
    %105 = arith.mulf %92, %104 : vector<8x32xf32>
    %106 = arith.addf %101, %105 : vector<8x32xf32>
    %107 = math.tanh %106 : vector<8x32xf32>
    %cst_31 = arith.constant 1.000000e+00 : f32
    %108 = vector.broadcast %cst_31 : f32 to vector<8x32xf32>
    %109 = arith.subf %108, %100 : vector<8x32xf32>
    %110 = arith.mulf %109, %107 : vector<8x32xf32>
    %111 = arith.mulf %100, %77 : vector<8x32xf32>
    %112 = arith.addf %110, %111 : vector<8x32xf32>
    %113 = arith.index_cast %81 : i32 to index
    %c0_32 = arith.constant 0 : index
    %114 = vector.load %arg14[%113, %c0_32] : memref<64x32xf32, #tpu.memory_space<vmem>>, vector<8x32xf32>
    tpu.vector_store %arg14[%113, %c0_32], %112 {strides = array<i32>} : memref<64x32xf32, #tpu.memory_space<vmem>>, vector<8x32xf32>,
    %c3_i32 = arith.constant 3 : i32
    %c8_i32_33 = arith.constant 8 : i32
    %115 = arith.muli %c3_i32, %c8_i32_33 : i32
    %116 = tpu.assume_multiple %115, 8 : i32
    %117 = arith.index_cast %116 : i32 to index
    %c0_34 = arith.constant 0 : index
    %118 = vector.load %arg13[%117, %c0_34] : memref<64x128xf32, #tpu.memory_space<vmem>>, vector<8x128xf32>
    %cst_35 = arith.constant dense<0.000000e+00> : vector<8x128xf32>
    %119 = tpu.matmul %112, %7, %cst_35 {dimension_numbers = #tpu.dot_dimension_numbers<[1], [0], [0], [1], [0, 0, 1, 1], [], []>} : vector<8x32xf32>, vector<32x128xf32>, vector<8x128xf32> -> vector<8x128xf32>
    %120 = vector.extract_strided_slice %118 {offsets = [0, 0], sizes = [8, 32], strides = [1, 1]} : vector<8x128xf32> to vector<8x32xf32>
    %121 = vector.extract_strided_slice %119 {offsets = [0, 0], sizes = [8, 32], strides = [1, 1]} : vector<8x128xf32> to vector<8x32xf32>
    %122 = arith.addf %120, %121 : vector<8x32xf32>
    %123 = arith.negf %122 : vector<8x32xf32>
    %124 = math.exp %123 : vector<8x32xf32>
    %cst_36 = arith.constant 1.000000e+00 : f32
    %125 = vector.broadcast %cst_36 : f32 to vector<8x32xf32>
    %126 = arith.addf %125, %124 : vector<8x32xf32>
    %127 = arith.divf %125, %126 : vector<8x32xf32>
    %128 = vector.extract_strided_slice %118 {offsets = [0, 32], sizes = [8, 32], strides = [1, 1]} : vector<8x128xf32> to vector<8x32xf32>
    %129 = vector.extract_strided_slice %119 {offsets = [0, 32], sizes = [8, 32], strides = [1, 1]} : vector<8x128xf32> to vector<8x32xf32>
    %130 = arith.addf %128, %129 : vector<8x32xf32>
    %131 = arith.negf %130 : vector<8x32xf32>
    %132 = math.exp %131 : vector<8x32xf32>
    %cst_37 = arith.constant 1.000000e+00 : f32
    %133 = vector.broadcast %cst_37 : f32 to vector<8x32xf32>
    %134 = arith.addf %133, %132 : vector<8x32xf32>
    %135 = arith.divf %133, %134 : vector<8x32xf32>
    %136 = vector.extract_strided_slice %118 {offsets = [0, 64], sizes = [8, 32], strides = [1, 1]} : vector<8x128xf32> to vector<8x32xf32>
    %137 = vector.extract_strided_slice %119 {offsets = [0, 64], sizes = [8, 32], strides = [1, 1]} : vector<8x128xf32> to vector<8x32xf32>
    %138 = vector.broadcast %8 : vector<1x32xf32> to vector<8x32xf32>
    %139 = arith.addf %137, %138 : vector<8x32xf32>
    %140 = arith.mulf %127, %139 : vector<8x32xf32>
    %141 = arith.addf %136, %140 : vector<8x32xf32>
    %142 = math.tanh %141 : vector<8x32xf32>
    %cst_38 = arith.constant 1.000000e+00 : f32
    %143 = vector.broadcast %cst_38 : f32 to vector<8x32xf32>
    %144 = arith.subf %143, %135 : vector<8x32xf32>
    %145 = arith.mulf %144, %142 : vector<8x32xf32>
    %146 = arith.mulf %135, %112 : vector<8x32xf32>
    %147 = arith.addf %145, %146 : vector<8x32xf32>
    %148 = arith.index_cast %116 : i32 to index
    %c0_39 = arith.constant 0 : index
    %149 = vector.load %arg14[%148, %c0_39] : memref<64x32xf32, #tpu.memory_space<vmem>>, vector<8x32xf32>
    tpu.vector_store %arg14[%148, %c0_39], %147 {strides = array<i32>} : memref<64x32xf32, #tpu.memory_space<vmem>>, vector<8x32xf32>,
    %c4_i32 = arith.constant 4 : i32
    %c8_i32_40 = arith.constant 8 : i32
    %150 = arith.muli %c4_i32, %c8_i32_40 : i32
    %151 = tpu.assume_multiple %150, 8 : i32
    %152 = arith.index_cast %151 : i32 to index
    %c0_41 = arith.constant 0 : index
    %153 = vector.load %arg13[%152, %c0_41] : memref<64x128xf32, #tpu.memory_space<vmem>>, vector<8x128xf32>
    %cst_42 = arith.constant dense<0.000000e+00> : vector<8x128xf32>
    %154 = tpu.matmul %147, %7, %cst_42 {dimension_numbers = #tpu.dot_dimension_numbers<[1], [0], [0], [1], [0, 0, 1, 1], [], []>} : vector<8x32xf32>, vector<32x128xf32>, vector<8x128xf32> -> vector<8x128xf32>
    %155 = vector.extract_strided_slice %153 {offsets = [0, 0], sizes = [8, 32], strides = [1, 1]} : vector<8x128xf32> to vector<8x32xf32>
    %156 = vector.extract_strided_slice %154 {offsets = [0, 0], sizes = [8, 32], strides = [1, 1]} : vector<8x128xf32> to vector<8x32xf32>
    %157 = arith.addf %155, %156 : vector<8x32xf32>
    %158 = arith.negf %157 : vector<8x32xf32>
    %159 = math.exp %158 : vector<8x32xf32>
    %cst_43 = arith.constant 1.000000e+00 : f32
    %160 = vector.broadcast %cst_43 : f32 to vector<8x32xf32>
    %161 = arith.addf %160, %159 : vector<8x32xf32>
    %162 = arith.divf %160, %161 : vector<8x32xf32>
    %163 = vector.extract_strided_slice %153 {offsets = [0, 32], sizes = [8, 32], strides = [1, 1]} : vector<8x128xf32> to vector<8x32xf32>
    %164 = vector.extract_strided_slice %154 {offsets = [0, 32], sizes = [8, 32], strides = [1, 1]} : vector<8x128xf32> to vector<8x32xf32>
    %165 = arith.addf %163, %164 : vector<8x32xf32>
    %166 = arith.negf %165 : vector<8x32xf32>
    %167 = math.exp %166 : vector<8x32xf32>
    %cst_44 = arith.constant 1.000000e+00 : f32
    %168 = vector.broadcast %cst_44 : f32 to vector<8x32xf32>
    %169 = arith.addf %168, %167 : vector<8x32xf32>
    %170 = arith.divf %168, %169 : vector<8x32xf32>
    %171 = vector.extract_strided_slice %153 {offsets = [0, 64], sizes = [8, 32], strides = [1, 1]} : vector<8x128xf32> to vector<8x32xf32>
    %172 = vector.extract_strided_slice %154 {offsets = [0, 64], sizes = [8, 32], strides = [1, 1]} : vector<8x128xf32> to vector<8x32xf32>
    %173 = vector.broadcast %8 : vector<1x32xf32> to vector<8x32xf32>
    %174 = arith.addf %172, %173 : vector<8x32xf32>
    %175 = arith.mulf %162, %174 : vector<8x32xf32>
    %176 = arith.addf %171, %175 : vector<8x32xf32>
    %177 = math.tanh %176 : vector<8x32xf32>
    %cst_45 = arith.constant 1.000000e+00 : f32
    %178 = vector.broadcast %cst_45 : f32 to vector<8x32xf32>
    %179 = arith.subf %178, %170 : vector<8x32xf32>
    %180 = arith.mulf %179, %177 : vector<8x32xf32>
    %181 = arith.mulf %170, %147 : vector<8x32xf32>
    %182 = arith.addf %180, %181 : vector<8x32xf32>
    %183 = arith.index_cast %151 : i32 to index
    %c0_46 = arith.constant 0 : index
    %184 = vector.load %arg14[%183, %c0_46] : memref<64x32xf32, #tpu.memory_space<vmem>>, vector<8x32xf32>
    tpu.vector_store %arg14[%183, %c0_46], %182 {strides = array<i32>} : memref<64x32xf32, #tpu.memory_space<vmem>>, vector<8x32xf32>,
    %c5_i32 = arith.constant 5 : i32
    %c8_i32_47 = arith.constant 8 : i32
    %185 = arith.muli %c5_i32, %c8_i32_47 : i32
    %186 = tpu.assume_multiple %185, 8 : i32
    %187 = arith.index_cast %186 : i32 to index
    %c0_48 = arith.constant 0 : index
    %188 = vector.load %arg13[%187, %c0_48] : memref<64x128xf32, #tpu.memory_space<vmem>>, vector<8x128xf32>
    %cst_49 = arith.constant dense<0.000000e+00> : vector<8x128xf32>
    %189 = tpu.matmul %182, %7, %cst_49 {dimension_numbers = #tpu.dot_dimension_numbers<[1], [0], [0], [1], [0, 0, 1, 1], [], []>} : vector<8x32xf32>, vector<32x128xf32>, vector<8x128xf32> -> vector<8x128xf32>
    %190 = vector.extract_strided_slice %188 {offsets = [0, 0], sizes = [8, 32], strides = [1, 1]} : vector<8x128xf32> to vector<8x32xf32>
    %191 = vector.extract_strided_slice %189 {offsets = [0, 0], sizes = [8, 32], strides = [1, 1]} : vector<8x128xf32> to vector<8x32xf32>
    %192 = arith.addf %190, %191 : vector<8x32xf32>
    %193 = arith.negf %192 : vector<8x32xf32>
    %194 = math.exp %193 : vector<8x32xf32>
    %cst_50 = arith.constant 1.000000e+00 : f32
    %195 = vector.broadcast %cst_50 : f32 to vector<8x32xf32>
    %196 = arith.addf %195, %194 : vector<8x32xf32>
    %197 = arith.divf %195, %196 : vector<8x32xf32>
    %198 = vector.extract_strided_slice %188 {offsets = [0, 32], sizes = [8, 32], strides = [1, 1]} : vector<8x128xf32> to vector<8x32xf32>
    %199 = vector.extract_strided_slice %189 {offsets = [0, 32], sizes = [8, 32], strides = [1, 1]} : vector<8x128xf32> to vector<8x32xf32>
    %200 = arith.addf %198, %199 : vector<8x32xf32>
    %201 = arith.negf %200 : vector<8x32xf32>
    %202 = math.exp %201 : vector<8x32xf32>
    %cst_51 = arith.constant 1.000000e+00 : f32
    %203 = vector.broadcast %cst_51 : f32 to vector<8x32xf32>
    %204 = arith.addf %203, %202 : vector<8x32xf32>
    %205 = arith.divf %203, %204 : vector<8x32xf32>
    %206 = vector.extract_strided_slice %188 {offsets = [0, 64], sizes = [8, 32], strides = [1, 1]} : vector<8x128xf32> to vector<8x32xf32>
    %207 = vector.extract_strided_slice %189 {offsets = [0, 64], sizes = [8, 32], strides = [1, 1]} : vector<8x128xf32> to vector<8x32xf32>
    %208 = vector.broadcast %8 : vector<1x32xf32> to vector<8x32xf32>
    %209 = arith.addf %207, %208 : vector<8x32xf32>
    %210 = arith.mulf %197, %209 : vector<8x32xf32>
    %211 = arith.addf %206, %210 : vector<8x32xf32>
    %212 = math.tanh %211 : vector<8x32xf32>
    %cst_52 = arith.constant 1.000000e+00 : f32
    %213 = vector.broadcast %cst_52 : f32 to vector<8x32xf32>
    %214 = arith.subf %213, %205 : vector<8x32xf32>
    %215 = arith.mulf %214, %212 : vector<8x32xf32>
    %216 = arith.mulf %205, %182 : vector<8x32xf32>
    %217 = arith.addf %215, %216 : vector<8x32xf32>
    %218 = arith.index_cast %186 : i32 to index
    %c0_53 = arith.constant 0 : index
    %219 = vector.load %arg14[%218, %c0_53] : memref<64x32xf32, #tpu.memory_space<vmem>>, vector<8x32xf32>
    tpu.vector_store %arg14[%218, %c0_53], %217 {strides = array<i32>} : memref<64x32xf32, #tpu.memory_space<vmem>>, vector<8x32xf32>,
    %c6_i32 = arith.constant 6 : i32
    %c8_i32_54 = arith.constant 8 : i32
    %220 = arith.muli %c6_i32, %c8_i32_54 : i32
    %221 = tpu.assume_multiple %220, 8 : i32
    %222 = arith.index_cast %221 : i32 to index
    %c0_55 = arith.constant 0 : index
    %223 = vector.load %arg13[%222, %c0_55] : memref<64x128xf32, #tpu.memory_space<vmem>>, vector<8x128xf32>
    %cst_56 = arith.constant dense<0.000000e+00> : vector<8x128xf32>
    %224 = tpu.matmul %217, %7, %cst_56 {dimension_numbers = #tpu.dot_dimension_numbers<[1], [0], [0], [1], [0, 0, 1, 1], [], []>} : vector<8x32xf32>, vector<32x128xf32>, vector<8x128xf32> -> vector<8x128xf32>
    %225 = vector.extract_strided_slice %223 {offsets = [0, 0], sizes = [8, 32], strides = [1, 1]} : vector<8x128xf32> to vector<8x32xf32>
    %226 = vector.extract_strided_slice %224 {offsets = [0, 0], sizes = [8, 32], strides = [1, 1]} : vector<8x128xf32> to vector<8x32xf32>
    %227 = arith.addf %225, %226 : vector<8x32xf32>
    %228 = arith.negf %227 : vector<8x32xf32>
    %229 = math.exp %228 : vector<8x32xf32>
    %cst_57 = arith.constant 1.000000e+00 : f32
    %230 = vector.broadcast %cst_57 : f32 to vector<8x32xf32>
    %231 = arith.addf %230, %229 : vector<8x32xf32>
    %232 = arith.divf %230, %231 : vector<8x32xf32>
    %233 = vector.extract_strided_slice %223 {offsets = [0, 32], sizes = [8, 32], strides = [1, 1]} : vector<8x128xf32> to vector<8x32xf32>
    %234 = vector.extract_strided_slice %224 {offsets = [0, 32], sizes = [8, 32], strides = [1, 1]} : vector<8x128xf32> to vector<8x32xf32>
    %235 = arith.addf %233, %234 : vector<8x32xf32>
    %236 = arith.negf %235 : vector<8x32xf32>
    %237 = math.exp %236 : vector<8x32xf32>
    %cst_58 = arith.constant 1.000000e+00 : f32
    %238 = vector.broadcast %cst_58 : f32 to vector<8x32xf32>
    %239 = arith.addf %238, %237 : vector<8x32xf32>
    %240 = arith.divf %238, %239 : vector<8x32xf32>
    %241 = vector.extract_strided_slice %223 {offsets = [0, 64], sizes = [8, 32], strides = [1, 1]} : vector<8x128xf32> to vector<8x32xf32>
    %242 = vector.extract_strided_slice %224 {offsets = [0, 64], sizes = [8, 32], strides = [1, 1]} : vector<8x128xf32> to vector<8x32xf32>
    %243 = vector.broadcast %8 : vector<1x32xf32> to vector<8x32xf32>
    %244 = arith.addf %242, %243 : vector<8x32xf32>
    %245 = arith.mulf %232, %244 : vector<8x32xf32>
    %246 = arith.addf %241, %245 : vector<8x32xf32>
    %247 = math.tanh %246 : vector<8x32xf32>
    %cst_59 = arith.constant 1.000000e+00 : f32
    %248 = vector.broadcast %cst_59 : f32 to vector<8x32xf32>
    %249 = arith.subf %248, %240 : vector<8x32xf32>
    %250 = arith.mulf %249, %247 : vector<8x32xf32>
    %251 = arith.mulf %240, %217 : vector<8x32xf32>
    %252 = arith.addf %250, %251 : vector<8x32xf32>
    %253 = arith.index_cast %221 : i32 to index
    %c0_60 = arith.constant 0 : index
    %254 = vector.load %arg14[%253, %c0_60] : memref<64x32xf32, #tpu.memory_space<vmem>>, vector<8x32xf32>
    tpu.vector_store %arg14[%253, %c0_60], %252 {strides = array<i32>} : memref<64x32xf32, #tpu.memory_space<vmem>>, vector<8x32xf32>,
    %c7_i32 = arith.constant 7 : i32
    %c8_i32_61 = arith.constant 8 : i32
    %255 = arith.muli %c7_i32, %c8_i32_61 : i32
    %256 = tpu.assume_multiple %255, 8 : i32
    %257 = arith.index_cast %256 : i32 to index
    %c0_62 = arith.constant 0 : index
    %258 = vector.load %arg13[%257, %c0_62] : memref<64x128xf32, #tpu.memory_space<vmem>>, vector<8x128xf32>
    %cst_63 = arith.constant dense<0.000000e+00> : vector<8x128xf32>
    %259 = tpu.matmul %252, %7, %cst_63 {dimension_numbers = #tpu.dot_dimension_numbers<[1], [0], [0], [1], [0, 0, 1, 1], [], []>} : vector<8x32xf32>, vector<32x128xf32>, vector<8x128xf32> -> vector<8x128xf32>
    %260 = vector.extract_strided_slice %258 {offsets = [0, 0], sizes = [8, 32], strides = [1, 1]} : vector<8x128xf32> to vector<8x32xf32>
    %261 = vector.extract_strided_slice %259 {offsets = [0, 0], sizes = [8, 32], strides = [1, 1]} : vector<8x128xf32> to vector<8x32xf32>
    %262 = arith.addf %260, %261 : vector<8x32xf32>
    %263 = arith.negf %262 : vector<8x32xf32>
    %264 = math.exp %263 : vector<8x32xf32>
    %cst_64 = arith.constant 1.000000e+00 : f32
    %265 = vector.broadcast %cst_64 : f32 to vector<8x32xf32>
    %266 = arith.addf %265, %264 : vector<8x32xf32>
    %267 = arith.divf %265, %266 : vector<8x32xf32>
    %268 = vector.extract_strided_slice %258 {offsets = [0, 32], sizes = [8, 32], strides = [1, 1]} : vector<8x128xf32> to vector<8x32xf32>
    %269 = vector.extract_strided_slice %259 {offsets = [0, 32], sizes = [8, 32], strides = [1, 1]} : vector<8x128xf32> to vector<8x32xf32>
    %270 = arith.addf %268, %269 : vector<8x32xf32>
    %271 = arith.negf %270 : vector<8x32xf32>
    %272 = math.exp %271 : vector<8x32xf32>
    %cst_65 = arith.constant 1.000000e+00 : f32
    %273 = vector.broadcast %cst_65 : f32 to vector<8x32xf32>
    %274 = arith.addf %273, %272 : vector<8x32xf32>
    %275 = arith.divf %273, %274 : vector<8x32xf32>
    %276 = vector.extract_strided_slice %258 {offsets = [0, 64], sizes = [8, 32], strides = [1, 1]} : vector<8x128xf32> to vector<8x32xf32>
    %277 = vector.extract_strided_slice %259 {offsets = [0, 64], sizes = [8, 32], strides = [1, 1]} : vector<8x128xf32> to vector<8x32xf32>
    %278 = vector.broadcast %8 : vector<1x32xf32> to vector<8x32xf32>
    %279 = arith.addf %277, %278 : vector<8x32xf32>
    %280 = arith.mulf %267, %279 : vector<8x32xf32>
    %281 = arith.addf %276, %280 : vector<8x32xf32>
    %282 = math.tanh %281 : vector<8x32xf32>
    %cst_66 = arith.constant 1.000000e+00 : f32
    %283 = vector.broadcast %cst_66 : f32 to vector<8x32xf32>
    %284 = arith.subf %283, %275 : vector<8x32xf32>
    %285 = arith.mulf %284, %282 : vector<8x32xf32>
    %286 = arith.mulf %275, %252 : vector<8x32xf32>
    %287 = arith.addf %285, %286 : vector<8x32xf32>
    %288 = arith.index_cast %256 : i32 to index
    %c0_67 = arith.constant 0 : index
    %289 = vector.load %arg14[%288, %c0_67] : memref<64x32xf32, #tpu.memory_space<vmem>>, vector<8x32xf32>
    tpu.vector_store %arg14[%288, %c0_67], %287 {strides = array<i32>} : memref<64x32xf32, #tpu.memory_space<vmem>>, vector<8x32xf32>,
    %c8_i32_68 = arith.constant 8 : i32
    %c0_69 = arith.constant 0 : index
    %c0_70 = arith.constant 0 : index
    %290 = vector.load %arg14[%c0_69, %c0_70] : memref<64x32xf32, #tpu.memory_space<vmem>>, vector<64x32xf32>
    %c0_71 = arith.constant 0 : index
    %c0_72 = arith.constant 0 : index
    %291 = vector.load %arg7[%c0_71, %c0_72] : memref<32x128xf32, #tpu.memory_space<vmem>>, vector<32x128xf32>
    %cst_73 = arith.constant dense<0.000000e+00> : vector<64x128xf32>
    %292 = tpu.matmul %290, %291, %cst_73 {dimension_numbers = #tpu.dot_dimension_numbers<[1], [0], [0], [1], [0, 0, 1, 1], [], []>} : vector<64x32xf32>, vector<32x128xf32>, vector<64x128xf32> -> vector<64x128xf32>
    %c0_74 = arith.constant 0 : index
    %c0_75 = arith.constant 0 : index
    %293 = vector.load %arg9[%c0_74, %c0_75] : memref<1x128xf32, #tpu.memory_space<vmem>>, vector<1x128xf32>
    %294 = vector.broadcast %293 : vector<1x128xf32> to vector<64x128xf32>
    %295 = arith.addf %292, %294 : vector<64x128xf32>
    %296 = arith.mulf %290, %290 : vector<64x32xf32>
    %c0_76 = arith.constant 0 : index
    %c0_77 = arith.constant 0 : index
    %297 = vector.load %arg8[%c0_76, %c0_77] : memref<32x128xf32, #tpu.memory_space<vmem>>, vector<32x128xf32>
    %cst_78 = arith.constant dense<0.000000e+00> : vector<64x128xf32>
    %298 = tpu.matmul %296, %297, %cst_78 {dimension_numbers = #tpu.dot_dimension_numbers<[1], [0], [0], [1], [0, 0, 1, 1], [], []>} : vector<64x32xf32>, vector<32x128xf32>, vector<64x128xf32> -> vector<64x128xf32>
    %c0_79 = arith.constant 0 : index
    %c0_80 = arith.constant 0 : index
    %299 = vector.load %arg10[%c0_79, %c0_80] : memref<1x128xf32, #tpu.memory_space<vmem>>, vector<1x128xf32>
    %300 = vector.broadcast %299 : vector<1x128xf32> to vector<64x128xf32>
    %301 = arith.addf %298, %300 : vector<64x128xf32>
    %cst_81 = arith.constant 0.392699093 : f32
    %302 = vector.broadcast %cst_81 : f32 to vector<64x128xf32>
    %303 = arith.mulf %302, %301 : vector<64x128xf32>
    %cst_82 = arith.constant 1.000000e+00 : f32
    %304 = vector.broadcast %cst_82 : f32 to vector<64x128xf32>
    %305 = arith.addf %304, %303 : vector<64x128xf32>
    %306 = math.rsqrt %305 : vector<64x128xf32>
    %307 = arith.mulf %295, %306 : vector<64x128xf32>
    %308 = arith.negf %307 : vector<64x128xf32>
    %309 = math.exp %308 : vector<64x128xf32>
    %cst_83 = arith.constant 1.000000e+00 : f32
    %310 = vector.broadcast %cst_83 : f32 to vector<64x128xf32>
    %311 = arith.addf %310, %309 : vector<64x128xf32>
    %312 = arith.divf %310, %311 : vector<64x128xf32>
    %cst_84 = arith.constant -0.881373584 : f32
    %313 = vector.broadcast %cst_84 : f32 to vector<64x128xf32>
    %314 = arith.addf %295, %313 : vector<64x128xf32>
    %cst_85 = arith.constant 1.17157292 : f32
    %315 = vector.broadcast %cst_85 : f32 to vector<64x128xf32>
    %316 = arith.mulf %315, %314 : vector<64x128xf32>
    %cst_86 = arith.constant 0.392699093 : f32
    %cst_87 = arith.constant 1.17157292 : f32
    %317 = arith.mulf %cst_86, %cst_87 : f32
    %cst_88 = arith.constant 1.17157292 : f32
    %318 = arith.mulf %317, %cst_88 : f32
    %319 = vector.broadcast %318 : f32 to vector<64x128xf32>
    %320 = arith.mulf %319, %301 : vector<64x128xf32>
    %cst_89 = arith.constant 1.000000e+00 : f32
    %321 = vector.broadcast %cst_89 : f32 to vector<64x128xf32>
    %322 = arith.addf %321, %320 : vector<64x128xf32>
    %323 = math.rsqrt %322 : vector<64x128xf32>
    %324 = arith.mulf %316, %323 : vector<64x128xf32>
    %325 = arith.negf %324 : vector<64x128xf32>
    %326 = math.exp %325 : vector<64x128xf32>
    %cst_90 = arith.constant 1.000000e+00 : f32
    %327 = vector.broadcast %cst_90 : f32 to vector<64x128xf32>
    %328 = arith.addf %327, %326 : vector<64x128xf32>
    %329 = arith.divf %327, %328 : vector<64x128xf32>
    %330 = arith.mulf %312, %312 : vector<64x128xf32>
    %331 = arith.subf %329, %330 : vector<64x128xf32>
    %c0_91 = arith.constant 0 : index
    %c0_92 = arith.constant 0 : index
    %332 = vector.load %arg11[%c0_91, %c0_92] : memref<64x128xf32, #tpu.memory_space<vmem>>, vector<64x128xf32>
    tpu.vector_store %arg11[%c0_91, %c0_92], %312 {strides = array<i32>} : memref<64x128xf32, #tpu.memory_space<vmem>>, vector<64x128xf32>,
    %c0_93 = arith.constant 0 : index
    %c0_94 = arith.constant 0 : index
    %333 = vector.load %arg12[%c0_93, %c0_94] : memref<64x128xf32, #tpu.memory_space<vmem>>, vector<64x128xf32>
    tpu.vector_store %arg12[%c0_93, %c0_94], %331 {strides = array<i32>} : memref<64x128xf32, #tpu.memory_space<vmem>>, vector<64x128xf32>,
    return
  }
  func.func @transform_0(%arg0: i32) -> (i32, i32) {
    %c0_i32 = arith.constant 0 : i32
    %c0_i32_0 = arith.constant 0 : i32
    %c0_i32_1 = arith.constant 0 : i32
    return %c0_i32, %c0_i32_0 : i32, i32
  }
  func.func @transform_1(%arg0: i32) -> (i32, i32) {
    %c0_i32 = arith.constant 0 : i32
    %c0_i32_0 = arith.constant 0 : i32
    %c0_i32_1 = arith.constant 0 : i32
    return %c0_i32, %c0_i32_0 : i32, i32
  }
  func.func @transform_2(%arg0: i32) -> (i32, i32) {
    %c0_i32 = arith.constant 0 : i32
    %c0_i32_0 = arith.constant 0 : i32
    %c0_i32_1 = arith.constant 0 : i32
    return %c0_i32, %c0_i32_0 : i32, i32
  }
  func.func @transform_3(%arg0: i32) -> (i32, i32) {
    %c0_i32 = arith.constant 0 : i32
    %c0_i32_0 = arith.constant 0 : i32
    %c0_i32_1 = arith.constant 0 : i32
    return %c0_i32, %c0_i32_0 : i32, i32
  }
  func.func @transform_4(%arg0: i32) -> (i32, i32) {
    %c0_i32 = arith.constant 0 : i32
    %c0_i32_0 = arith.constant 0 : i32
    %c0_i32_1 = arith.constant 0 : i32
    return %c0_i32, %c0_i32_0 : i32, i32
  }
  func.func @transform_5(%arg0: i32) -> (i32, i32) {
    %c0_i32 = arith.constant 0 : i32
    %c0_i32_0 = arith.constant 0 : i32
    %c0_i32_1 = arith.constant 0 : i32
    return %c0_i32, %c0_i32_0 : i32, i32
  }
  func.func @transform_6(%arg0: i32) -> (i32, i32) {
    %c0_i32 = arith.constant 0 : i32
    %c0_i32_0 = arith.constant 0 : i32
    %c0_i32_1 = arith.constant 0 : i32
    return %c0_i32, %c0_i32_0 : i32, i32
  }
  func.func @transform_7(%arg0: i32) -> (i32, i32) {
    %c0_i32 = arith.constant 0 : i32
    %c0_i32_0 = arith.constant 0 : i32
    %c0_i32_1 = arith.constant 0 : i32
    return %c0_i32, %c0_i32_0 : i32, i32
  }
  func.func @transform_8(%arg0: i32) -> (i32, i32) {
    %c0_i32 = arith.constant 0 : i32
    %c0_i32_0 = arith.constant 0 : i32
    %c0_i32_1 = arith.constant 0 : i32
    return %c0_i32, %c0_i32_0 : i32, i32
  }
  func.func @transform_9(%arg0: i32) -> (i32, i32) {
    %c0_i32 = arith.constant 0 : i32
    %c0_i32_0 = arith.constant 0 : i32
    %c0_i32_1 = arith.constant 0 : i32
    return %c0_i32, %c0_i32_0 : i32, i32
  }
  func.func @transform_10(%arg0: i32) -> (i32, i32) {
    %c0_i32 = arith.constant 0 : i32
    %c0_i32_0 = arith.constant 0 : i32
    %c0_i32_1 = arith.constant 0 : i32
    return %c0_i32, %c0_i32_0 : i32, i32
  }
  func.func @transform_11(%arg0: i32) -> (i32, i32) {
    %c0_i32 = arith.constant 0 : i32
    %c0_i32_0 = arith.constant 0 : i32
    %c0_i32_1 = arith.constant 0 : i32
    return %c0_i32, %c0_i32_0 : i32, i32
  }
}

</mosaic_0001>

<bundles_post_ra>
// kernel: gru_npn_forward.1
= control target key start
LH: loop header
LB: loop body
LE: loop exit
PB: predicated region body
PF: predicated region fallthrough
CT: control target
= control target key end

     0   :  { %v2084_v0 = vmov 0.0|0.0   ;;  %vm2085_vm0 = vmmov 0   ;;  %v2086_v4 = vmov 0.0   ;;  %vm56_vm1 = vcmask 261120   ;;  %s2089_s22 = smov 96   ;;  %s2488_s2 = inlined_call_operand.vmem [shape: f32[32,128], index: 2, kind: input, shape index: {}]   ;;  %s2489_s4 = inlined_call_operand.vmem [shape: f32[32,128], index: 4, kind: input, shape index: {}]   ;;  %s2490_s0 = inlined_call_operand.vmem [shape: f32[64,32], index: 0, kind: input, shape index: {}]   ;;  %s2491_s5 = inlined_call_operand.vmem [shape: f32[1,32], index: 5, kind: input, shape index: {}]   ;;  %s2492_s1 = inlined_call_operand.vmem [shape: f32[8,32], index: 1, kind: input, shape index: {}]   ;;  %s2493_s3 = inlined_call_operand.vmem [shape: f32[1,128], index: 3, kind: input, shape index: {}]   ;;  %s2494_s6 = inlined_call_operand.vmem [shape: f32[32,128], index: 6, kind: input, shape index: {}]   ;;  %s2495_s7 = inlined_call_operand.vmem [shape: f32[32,128], index: 7, kind: input, shape index: {}]   ;;  %s2496_s9 = inlined_call_operand.vmem [shape: f32[1,128], index: 9, kind: input, shape index: {}]   ;;  %s2497_s8 = inlined_call_operand.vmem [shape: f32[1,128], index: 8, kind: input, shape index: {}]   ;;  %s2498_s10 = inlined_call_operand.vmem [shape: f32[64,128], index: 10, kind: output, shape index: {0}]   ;;  %s2499_s11 = inlined_call_operand.vmem [shape: f32[64,128], index: 11, kind: output, shape index: {1}]  }
   0x1   :  { %1870 = vmatprep.subr.bf16.mxu1 %v2084_v0  ;;  %v45_v1 = vld [vmem:[%s2488_s2] sm:$0xff]  ;;  %v46_v2 = vld [vmem:[%s2488_s2 + $0x8] sm:$0xff]  ;;  %1742 = vmatprep.mubr.msk.f32.mxu1 %vm2085_vm0, %v2086_v4  ;;  %v47_v7 = vld [vmem:[%s2488_s2 + $0x10] sm:$0xff] }
   0x2   :  { %v194_v3 = vld [vmem:[%s2489_s4] sm:$0xff]  ;;  %v1862_v5 = vpack.c.bf16 %v46_v2, %v45_v1  ;;  %v195_v6 = vld [vmem:[%s2489_s4 + $0x8] sm:$0xff]  ;;  %v48_v8 = vld [vmem:[%s2488_s2 + $0x18] sm:$0xff] }
   0x3   :  { %v2171_v9 = vpack.c.bf16 %v195_v6, %v194_v3  ;;  %v1866_v10 = vpack.c.bf16 %v48_v8, %v47_v7  ;;  %v196_v11 = vld [vmem:[%s2489_s4 + $0x10] sm:$0xff]  ;;  %v197_v12 = vld [vmem:[%s2489_s4 + $0x18] sm:$0xff]  ;;  %v37_v13 = vld [vmem:[%s2490_s0] sm:$0xff]  ;;  %s2087_s4 = smov 64  }
   0x4   :  { %1863 = vmatprep.subr.bf16.mxu0 %v1862_v5  ;;  %1722 = vmatprep.mubr.msk.f32.mxu0 %vm56_vm1, %v37_v13  ;;  %v1589_v14 = vld [vmem:[%s2491_s5] ss:$0 sm:$0xff]  ;;  %v2187_v15 = vpack.c.bf16 %v197_v12, %v196_v11  ;;  %v38_v17 = vld [vmem:[%s2490_s0 + $0x8] sm:$0xff]  ;;  %v39_v56 = vld [vmem:[%s2490_s0 + $0x10] sm:$0xff] }
   0x5   :  { %1872 = vmatpush3.bf16.msra.mxu1 %v2171_v9  ;;  %1865 = vmatpush3.bf16.msra.mxu0 %v1862_v5  ;;  %v199_v16 = vld [vmem:[%s2492_s1] sm:$0xff]  ;;  %s2088_s1 = smov 32   ;;  %v40_v57 = vld [vmem:[%s2490_s0 + $0x18] sm:$0xff]  ;;  %v42_v59 = vld [vmem:[%s2490_s0 + $0x28] sm:$0xff] }
   0x6   :  { %1873 = vmatprep.subr.bf16.mxu1 %v2084_v0  ;;  %1867 = vmatprep.subr.bf16.mxu0 %v1866_v10  ;;  %v2219_v24 = vld [vmem:[%s2493_s3] ss:$0 sm:$0xff]  ;;  %v43_v60 = vld [vmem:[%s2490_s0 + $0x30] sm:$0xff]  ;;  %v44_v61 = vld [vmem:[%s2490_s0 + $0x38] sm:$0xff] }
   0x7   :  { %286 = vrot.lane.b32.xlu0 %v1589_v14, %s2087_s4  ;;  %v41_v58 = vld [vmem:[%s2490_s0 + $0x20] sm:$0xff] }
   0x9   :  { %1875 = vmatpush3.bf16.msra.mxu1 %v2187_v15  ;;  %1869 = vmatpush3.bf16.msra.mxu0 %v1866_v10 }
   0xa   :  { %1876 = vmatprep.subr.bf16.mxu1 %v2084_v0  ;;  %1882 = vmatprep.subr.bf16.mxu0 %v2084_v0 }
   0xc   :  { %1743 = vmatmul.mubr.msk.f32.vlgmr.msra.gmra.mrb[0].mxu1 %vm56_vm1, %v199_v16  ;;  %1723 = vmatmul.mubr.msk.f32.vlgmr.msra.gmra.mrb[0].mxu0 %vm56_vm1, %v38_v17 }
   0xd   :  { %1878 = vmatpush3.bf16.msra.mxu1 %v2171_v9  ;;  %1753 = vmatprep.mubr.msk.f32.mxu1 %vm2085_vm0, %v2086_v4 }
   0xe   :  { %1879 = vmatprep.subr.bf16.mxu1 %v2084_v0  ;;  %1884 = vmatpush3.bf16.msra.mxu0 %v2171_v9 }
   0xf   :  { %1885 = vmatprep.subr.bf16.mxu0 %v2084_v0  ;;  %1725 = vmatprep.mubr.msk.f32.mxu0 %vm56_vm1, %v39_v56 }
  0x10   :  { %1726 = vmatmul.mubr.msk.f32.gmra.mrb[2].mxu0 %vm56_vm1, %v40_v57 }
  0x11   :  { %1881 = vmatpush3.bf16.msra.mxu1 %v2187_v15  ;;  %1728 = vmatprep.mubr.msk.f32.mxu0 %vm56_vm1, %v41_v58 }
  0x12   :  { %1887 = vmatpush3.bf16.msra.mxu0 %v2187_v15  ;;  %1888 = vmatprep.subr.bf16.mxu1 %v2084_v0 }
  0x13   :  { %1894 = vmatprep.subr.bf16.mxu0 %v2084_v0 }
  0x14   :  { %1729 = vmatmul.mubr.msk.f32.gmra.mrb[4].mxu0 %vm56_vm1, %v42_v59 }
  0x15   :  { %1731 = vmatprep.mubr.msk.f32.mxu0 %vm56_vm1, %v43_v60 }
  0x18   :  { %1732 = vmatmul.mubr.msk.f32.gmra.mrb[6].mxu0 %vm56_vm1, %v44_v61 }
  0x19   :  { %1764 = vmatprep.mubr.msk.f32.mxu0 %vm2085_vm0, %v2086_v4 }
  0x79   :  { %v2212_v18 = vpop.permute.xlu0 %286 }
  0xdf   :  { %v270_v19 = vpop.f32.mrb[0].mxu1  ;;  %v1724_v20 = vpop.f32.mrb[0].mxu0 }
  0xe0   :  { %v289_v21 = vadd.f32 %v2212_v18, %v270_v19  ;;  %v1744_v22 = vpop.f32.mrb[1].mxu1  ;;  %v147_v23 = vpop.f32.mrb[1].mxu0  ;;  %v153_v46 = vadd.f32 %v1724_v20, %v2219_v24 }
  0xe1   :  { %v148_v25 = vadd.f32 %v2219_v24, %v147_v23 }
  0xe2   :  { %291 = vrot.lane.b32.xlu0 %v289_v21, %s2087_s4 }
  0xe3   :  { %v274_v26 = vadd.f32 %v270_v19, %v148_v25  ;;  %v1727_v6 = vpop.f32.mrb[2].mxu0 }
  0xe4   :  { %v157_v7 = vpop.f32.mrb[3].mxu0 }
  0xe5   :  { %v1588_v27 = vmul.f32 -1.442695, %v274_v26  ;;  %v158_v19 = vadd.f32 %v2219_v24, %v157_v7 }
  0xe6   :  { %307 = vrot.lane.b32.xlu0 %v199_v16, %s2088_s1 }
  0xe7   :  { %1940 = vpow2.f32 %v1588_v27  ;;  %v2265_v8 = vpop.f32.mrb[4].mxu0 }
  0xe8   :  { %v2267_v10 = vpop.f32.mrb[5].mxu0 }
  0xe9   :  { %v168_v60 = vadd.f32 %v2219_v24, %v2267_v10 }
  0xeb   :  { %v2269_v11 = vpop.f32.mrb[6].mxu0 }
  0xec   :  { %v2271_v12 = vpop.f32.mrb[7].mxu0 }
  0xf1   :  { %v1941_v28 = vpop.eup %1940 }
  0xf2   :  { %v278_v29 = vadd.f32 1.0, %v1941_v28 }
  0xf4   :  { %1942 = vrcp.f32 %v278_v29 }
  0xfe   :  { %v1943_v30 = vpop.eup %1942 }
  0xff   :  { %v301_v37 = vsub.f32 1.0, %v1943_v30 }
 0x154   :  { %v292_v31 = vpop.permute.xlu0 %291 }
 0x155   :  { %v294_v32 = vmul.f32 %v1943_v30, %v292_v31 }
 0x157   :  { %296 = vrot.lane.b32.xlu1 %v294_v32, %s2087_s4 }
 0x158   :  { %v308_v36 = vpop.permute.xlu0 %307 }
 0x159   :  { %v310_v39 = vmul.f32 %v1943_v30, %v308_v36 }
 0x1c9   :  { %v297_v33 = vpop.permute.xlu1 %296 }
 0x1ca   :  { %v299_v34 = vadd.f32 %v297_v33, %v148_v25 }
 0x1cc   :  { %1944 = vtanh.f32 %v299_v34 }
 0x1d6   :  { %v1945_v35 = vpop.eup %1944 }
 0x1d7   :  { %303 = vrot.lane.b32.xlu1 %v1945_v35, %s2089_s22 }
 0x249   :  { %v304_v38 = vpop.permute.xlu1 %303 }
 0x24a   :  { %v306_v40 = vmul.f32 %v304_v38, %v301_v37 }
 0x24c   :  { %v311_v41 = vadd.f32 %v310_v39, %v306_v40  ;;  %v163_v40 = vadd.f32 %v1727_v6, %v2219_v24 }
 0x24e   :  { %313 = vrot.lane.b32.xlu1 %v311_v41, %s2089_s22 }
 0x2c0   :  { %v314_v42 = vpop.permute.xlu1 %313 }
 0x2c1   :  { %316 = vst.msk [vmem:[#allocation3] sm:$0xff] %vm56_vm1, %v314_v42  ;;  %1754 = vmatmul.mubr.msk.f32.vlgmr.msra.gmra.mrb[2].mxu1 %vm56_vm1, %v314_v42 }
 0x2c2   :  { %1890 = vmatpush3.bf16.msra.mxu1 %v2171_v9  ;;  %1775 = vmatprep.mubr.msk.f32.mxu1 %vm2085_vm0, %v2086_v4 }
 0x2c3   :  { %1891 = vmatprep.subr.bf16.mxu1 %v2084_v0 }
 0x2c6   :  { %1893 = vmatpush3.bf16.msra.mxu1 %v2187_v15 }
 0x2c7   :  { %1900 = vmatprep.subr.bf16.mxu1 %v2084_v0 }
 0x394   :  { %v387_v43 = vpop.f32.mrb[2].mxu1 }
 0x395   :  { %v398_v44 = vadd.f32 %v387_v43, %v2212_v18  ;;  %v1755_v45 = vpop.f32.mrb[3].mxu1  ;;  %v391_v47 = vadd.f32 %v387_v43, %v153_v46 }
 0x397   :  { %400 = vrot.lane.b32.xlu0 %v398_v44, %s2087_s4  ;;  %v1591_v48 = vmul.f32 -1.442695, %v391_v47 }
 0x399   :  { %1946 = vpow2.f32 %v1591_v48 }
 0x3a3   :  { %v1947_v49 = vpop.eup %1946 }
 0x3a4   :  { %v395_v50 = vadd.f32 1.0, %v1947_v49 }
 0x3a6   :  { %1948 = vrcp.f32 %v395_v50 }
 0x3b0   :  { %v1949_v51 = vpop.eup %1948 }
 0x3b1   :  { %v410_v63 = vsub.f32 1.0, %v1949_v51  ;;  %v416_v2 = vmul.f32 %v1949_v51, %v311_v41 }
 0x409   :  { %v401_v52 = vpop.permute.xlu0 %400 }
 0x40a   :  { %v403_v53 = vmul.f32 %v1949_v51, %v401_v52 }
 0x40c   :  { %405 = vrot.lane.b32.xlu1 %v403_v53, %s2087_s4 }
 0x47e   :  { %v406_v54 = vpop.permute.xlu1 %405 }
 0x47f   :  { %v408_v55 = vadd.f32 %v406_v54, %v153_v46 }
 0x481   :  { %1950 = vtanh.f32 %v408_v55 }
 0x48b   :  { %v1951_v62 = vpop.eup %1950 }
 0x48c   :  { %412 = vrot.lane.b32.xlu0 %v1951_v62, %s2089_s22 }
 0x4fe   :  { %v413_v1 = vpop.permute.xlu0 %412 }
 0x4ff   :  { %v415_v3 = vmul.f32 %v413_v1, %v410_v63 }
 0x501   :  { %v417_v5 = vadd.f32 %v416_v2, %v415_v3 }
 0x503   :  { %419 = vrot.lane.b32.xlu1 %v417_v5, %s2089_s22 }
 0x575   :  { %v420_v13 = vpop.permute.xlu1 %419 }
 0x576   :  { %423 = vst.msk [vmem:[#allocation3 + $0x8] sm:$0xff] %vm56_vm1, %v420_v13  ;;  %1765 = vmatmul.mubr.msk.f32.vlgmr.msra.gmra.mrb[8].mxu0 %vm56_vm1, %v420_v13 }
 0x577   :  { %1896 = vmatpush3.bf16.msra.mxu0 %v2171_v9  ;;  %1786 = vmatprep.mubr.msk.f32.mxu0 %vm2085_vm0, %v2086_v4 }
 0x578   :  { %1897 = vmatprep.subr.bf16.mxu0 %v2084_v0 }
 0x57b   :  { %1899 = vmatpush3.bf16.msra.mxu0 %v2187_v15 }
 0x57c   :  { %1906 = vmatprep.subr.bf16.mxu0 %v2084_v0 }
 0x649   :  { %v494_v14 = vpop.f32.mrb[8].mxu0 }
 0x64a   :  { %v505_v16 = vadd.f32 %v494_v14, %v2212_v18  ;;  %v1766_v17 = vpop.f32.mrb[9].mxu0  ;;  %v498_v20 = vadd.f32 %v494_v14, %v158_v19 }
 0x64c   :  { %507 = vrot.lane.b32.xlu0 %v505_v16, %s2087_s4  ;;  %v1593_v21 = vmul.f32 -1.442695, %v498_v20 }
 0x64e   :  { %1952 = vpow2.f32 %v1593_v21 }
 0x658   :  { %v1953_v22 = vpop.eup %1952 }
 0x659   :  { %v502_v23 = vadd.f32 1.0, %v1953_v22 }
 0x65b   :  { %1954 = vrcp.f32 %v502_v23 }
 0x665   :  { %v1955_v25 = vpop.eup %1954 }
 0x666   :  { %v517_v31 = vsub.f32 1.0, %v1955_v25  ;;  %v523_v33 = vmul.f32 %v1955_v25, %v417_v5 }
 0x6be   :  { %v508_v26 = vpop.permute.xlu0 %507 }
 0x6bf   :  { %v510_v27 = vmul.f32 %v1955_v25, %v508_v26  ;;  %v173_v25 = vadd.f32 %v2265_v8, %v2219_v24  ;;  %v1075_v8 = vld [vmem:[%s2494_s6 + $0x8] sm:$0xff] }
 0x6c1   :  { %512 = vrot.lane.b32.xlu1 %v510_v27, %s2087_s4 }
 0x733   :  { %v513_v28 = vpop.permute.xlu1 %512 }
 0x734   :  { %v515_v29 = vadd.f32 %v513_v28, %v158_v19 }
 0x736   :  { %1956 = vtanh.f32 %v515_v29 }
 0x740   :  { %v1957_v30 = vpop.eup %1956 }
 0x741   :  { %519 = vrot.lane.b32.xlu0 %v1957_v30, %s2089_s22 }
 0x7b3   :  { %v520_v32 = vpop.permute.xlu0 %519 }
 0x7b4   :  { %v522_v34 = vmul.f32 %v520_v32, %v517_v31  ;;  %v1074_v31 = vld [vmem:[%s2494_s6] sm:$0xff] }
 0x7b5   :  { %v1918_v32 = vpack.c.bf16 %v1075_v8, %v1074_v31  ;;  %v2401_v8 = vld [vmem:[%s2496_s9] ss:$0 sm:$0xff] }
 0x7b6   :  { %v524_v35 = vadd.f32 %v523_v33, %v522_v34 }
 0x7b8   :  { %526 = vrot.lane.b32.xlu1 %v524_v35, %s2089_s22 }
 0x82a   :  { %v527_v36 = vpop.permute.xlu1 %526 }
 0x82b   :  { %530 = vst.msk [vmem:[#allocation3 + $0x10] sm:$0xff] %vm56_vm1, %v527_v36  ;;  %1776 = vmatmul.mubr.msk.f32.vlgmr.msra.gmra.mrb[4].mxu1 %vm56_vm1, %v527_v36 }
 0x82c   :  { %1902 = vmatpush3.bf16.msra.mxu1 %v2171_v9  ;;  %1797 = vmatprep.mubr.msk.f32.mxu1 %vm2085_vm0, %v2086_v4 }
 0x82d   :  { %1903 = vmatprep.subr.bf16.mxu1 %v2084_v0 }
 0x830   :  { %1905 = vmatpush3.bf16.msra.mxu1 %v2187_v15 }
 0x831   :  { %1912 = vmatprep.subr.bf16.mxu1 %v2084_v0 }
 0x8fe   :  { %v601_v37 = vpop.f32.mrb[4].mxu1 }
 0x8ff   :  { %v612_v38 = vadd.f32 %v601_v37, %v2212_v18  ;;  %v1777_v39 = vpop.f32.mrb[5].mxu1  ;;  %v605_v41 = vadd.f32 %v601_v37, %v163_v40 }
 0x900   :  { %v1076_v39 = vld [vmem:[%s2494_s6 + $0x10] sm:$0xff] }
 0x901   :  { %614 = vrot.lane.b32.xlu0 %v612_v38, %s2087_s4  ;;  %v1595_v42 = vmul.f32 -1.442695, %v605_v41 }
 0x903   :  { %1958 = vpow2.f32 %v1595_v42 }
 0x90d   :  { %v1959_v43 = vpop.eup %1958 }
 0x90e   :  { %v609_v44 = vadd.f32 1.0, %v1959_v43  ;;  %v1066_v43 = vld [vmem:[#allocation3] sm:$0xff] }
 0x910   :  { %1960 = vrcp.f32 %v609_v44  ;;  %v1067_v44 = vld [vmem:[#allocation3 + $0x8] sm:$0xff] }
 0x91a   :  { %v1961_v45 = vpop.eup %1960 }
 0x91b   :  { %v624_v51 = vsub.f32 1.0, %v1961_v45  ;;  %v630_v53 = vmul.f32 %v1961_v45, %v524_v35 }
 0x973   :  { %v615_v46 = vpop.permute.xlu0 %614 }
 0x974   :  { %v617_v47 = vmul.f32 %v1961_v45, %v615_v46  ;;  %v1068_v45 = vld [vmem:[#allocation3 + $0x10] sm:$0xff] }
 0x976   :  { %619 = vrot.lane.b32.xlu1 %v617_v47, %s2087_s4 }
 0x9e8   :  { %v620_v48 = vpop.permute.xlu1 %619 }
 0x9e9   :  { %v622_v49 = vadd.f32 %v620_v48, %v163_v40  ;;  %v1077_v40 = vld [vmem:[%s2494_s6 + $0x18] sm:$0xff] }
 0x9ea   :  { %v1922_v41 = vpack.c.bf16 %v1077_v40, %v1076_v39 }
 0x9eb   :  { %1962 = vtanh.f32 %v622_v49 }
 0x9f5   :  { %v1963_v50 = vpop.eup %1962 }
 0x9f6   :  { %626 = vrot.lane.b32.xlu0 %v1963_v50, %s2089_s22 }
 0xa68   :  { %v627_v52 = vpop.permute.xlu0 %626 }
 0xa69   :  { %v629_v54 = vmul.f32 %v627_v52, %v624_v51 }
 0xa6b   :  { %v631_v55 = vadd.f32 %v630_v53, %v629_v54 }
 0xa6d   :  { %633 = vrot.lane.b32.xlu1 %v631_v55, %s2089_s22 }
 0xadf   :  { %v634_v56 = vpop.permute.xlu1 %633 }
 0xae0   :  { %637 = vst.msk [vmem:[#allocation3 + $0x18] sm:$0xff] %vm56_vm1, %v634_v56  ;;  %1787 = vmatmul.mubr.msk.f32.vlgmr.msra.gmra.mrb[10].mxu0 %vm56_vm1, %v634_v56 }
 0xae1   :  { %1908 = vmatpush3.bf16.msra.mxu0 %v2171_v9  ;;  %1808 = vmatprep.mubr.msk.f32.mxu0 %vm2085_vm0, %v2086_v4 }
 0xae2   :  { %1909 = vmatprep.subr.bf16.mxu0 %v2084_v0 }
 0xae5   :  { %1911 = vmatpush3.bf16.msra.mxu0 %v2187_v15 }
 0xae6   :  { %1919 = vmatprep.subr.bf16.mxu0 %v1918_v32 }
 0xae7   :  { %v1069_v46 = vld [vmem:[#allocation3 + $0x18] sm:$0xff] }
 0xbb3   :  { %v708_v57 = vpop.f32.mrb[10].mxu0 }
 0xbb4   :  { %v719_v58 = vadd.f32 %v708_v57, %v2212_v18  ;;  %v1788_v59 = vpop.f32.mrb[11].mxu0  ;;  %v712_v61 = vadd.f32 %v708_v57, %v168_v60 }
 0xbb6   :  { %721 = vrot.lane.b32.xlu0 %v719_v58, %s2087_s4  ;;  %v1597_v62 = vmul.f32 -1.442695, %v712_v61  ;;  %v178_v58 = vadd.f32 %v2219_v24, %v2271_v12  ;;  %v1223_v12 = vld [vmem:[%s2495_s7 + $0x8] sm:$0xff] }
 0xbb8   :  { %1964 = vpow2.f32 %v1597_v62 }
 0xbc2   :  { %v1965_v63 = vpop.eup %1964 }
 0xbc3   :  { %v716_v1 = vadd.f32 1.0, %v1965_v63 }
 0xbc5   :  { %1966 = vrcp.f32 %v716_v1 }
 0xbcf   :  { %v1967_v2 = vpop.eup %1966 }
 0xbd0   :  { %v731_v14 = vsub.f32 1.0, %v1967_v2  ;;  %v737_v10 = vmul.f32 %v1967_v2, %v631_v55 }
 0xc28   :  { %v722_v3 = vpop.permute.xlu0 %721 }
 0xc29   :  { %v724_v5 = vmul.f32 %v1967_v2, %v722_v3 }
 0xc2b   :  { %726 = vrot.lane.b32.xlu1 %v724_v5, %s2087_s4 }
 0xc9d   :  { %v727_v6 = vpop.permute.xlu1 %726 }
 0xc9e   :  { %v729_v7 = vadd.f32 %v727_v6, %v168_v60  ;;  %v1222_v6 = vld [vmem:[%s2495_s7] sm:$0xff] }
 0xca0   :  { %1968 = vtanh.f32 %v729_v7  ;;  %v1926_v7 = vpack.c.bf16 %v1223_v12, %v1222_v6 }
 0xcaa   :  { %v1969_v13 = vpop.eup %1968 }
 0xcab   :  { %733 = vrot.lane.b32.xlu0 %v1969_v13, %s2089_s22 }
 0xd1d   :  { %v734_v16 = vpop.permute.xlu0 %733 }
 0xd1e   :  { %v736_v17 = vmul.f32 %v734_v16, %v731_v14 }
 0xd20   :  { %v738_v19 = vadd.f32 %v737_v10, %v736_v17 }
 0xd22   :  { %740 = vrot.lane.b32.xlu1 %v738_v19, %s2089_s22 }
 0xd94   :  { %v741_v20 = vpop.permute.xlu1 %740 }
 0xd95   :  { %744 = vst.msk [vmem:[#allocation3 + $0x20] sm:$0xff] %vm56_vm1, %v741_v20  ;;  %1798 = vmatmul.mubr.msk.f32.vlgmr.msra.gmra.mrb[6].mxu1 %vm56_vm1, %v741_v20  ;;  %v1224_v20 = vld [vmem:[%s2495_s7 + $0x10] sm:$0xff] }
 0xd96   :  { %1914 = vmatpush3.bf16.msra.mxu1 %v2171_v9  ;;  %1819 = vmatprep.mubr.msk.f32.mxu1 %vm2085_vm0, %v2086_v4 }
 0xd97   :  { %1915 = vmatprep.subr.bf16.mxu1 %v2084_v0 }
 0xd9a   :  { %1917 = vmatpush3.bf16.msra.mxu1 %v2187_v15 }
 0xd9b   :  { %1927 = vmatprep.subr.bf16.mxu1 %v1926_v7 }
 0xd9c   :  { %v1070_v47 = vld [vmem:[#allocation3 + $0x20] sm:$0xff] }
 0xe68   :  { %v815_v21 = vpop.f32.mrb[6].mxu1 }
 0xe69   :  { %v826_v22 = vadd.f32 %v815_v21, %v2212_v18  ;;  %v1799_v23 = vpop.f32.mrb[7].mxu1  ;;  %v819_v26 = vadd.f32 %v815_v21, %v173_v25  ;;  %v1225_v21 = vld [vmem:[%s2495_s7 + $0x18] sm:$0xff] }
 0xe6a   :  { %v1214_v23 = vmul.f32 %v1066_v43, %v1066_v43 }
 0xe6b   :  { %828 = vrot.lane.b32.xlu0 %v826_v22, %s2087_s4  ;;  %v1599_v27 = vmul.f32 -1.442695, %v819_v26  ;;  %v1930_v22 = vpack.c.bf16 %v1225_v21, %v1224_v20  ;;  %v1215_v26 = vmul.f32 %v1067_v44, %v1067_v44 }
 0xe6d   :  { %1970 = vpow2.f32 %v1599_v27  ;;  %v1216_v27 = vmul.f32 %v1068_v45, %v1068_v45 }
 0xe77   :  { %v1971_v9 = vpop.eup %1970 }
 0xe78   :  { %v823_v28 = vadd.f32 1.0, %v1971_v9 }
 0xe7a   :  { %1972 = vrcp.f32 %v823_v28  ;;  %v1217_v28 = vmul.f32 %v1069_v46, %v1069_v46 }
 0xe84   :  { %v1973_v4 = vpop.eup %1972 }
 0xe85   :  { %v838_v34 = vsub.f32 1.0, %v1973_v4  ;;  %v844_v36 = vmul.f32 %v1973_v4, %v738_v19 }
 0xedd   :  { %v829_v29 = vpop.permute.xlu0 %828 }
 0xede   :  { %v831_v0 = vmul.f32 %v1973_v4, %v829_v29  ;;  %v1218_v4 = vmul.f32 %v1070_v47, %v1070_v47 }
 0xee0   :  { %833 = vrot.lane.b32.xlu1 %v831_v0, %s2087_s4 }
 0xf52   :  { %v834_v15 = vpop.permute.xlu1 %833 }
 0xf53   :  { %v836_v30 = vadd.f32 %v834_v15, %v173_v25 }
 0xf55   :  { %1974 = vtanh.f32 %v836_v30 }
 0xf5f   :  { %v1975_v33 = vpop.eup %1974 }
 0xf60   :  { %840 = vrot.lane.b32.xlu0 %v1975_v33, %s2089_s22 }
 0xfd2   :  { %v841_v35 = vpop.permute.xlu0 %840 }
 0xfd3   :  { %v843_v37 = vmul.f32 %v841_v35, %v838_v34 }
 0xfd5   :  { %v845_v38 = vadd.f32 %v844_v36, %v843_v37 }
 0xfd7   :  { %847 = vrot.lane.b32.xlu1 %v845_v38, %s2089_s22 }
0x1049   :  { %v848_v42 = vpop.permute.xlu1 %847 }
0x104a   :  { %851 = vst.msk [vmem:[#allocation3 + $0x28] sm:$0xff] %vm56_vm1, %v848_v42  ;;  %1809 = vmatmul.mubr.msk.f32.vlgmr.msra.gmra.mrb[12].mxu0 %vm56_vm1, %v848_v42 }
0x104b   :  { %1921 = vmatpush3.bf16.msra.mxu0 %v1918_v32  ;;  %1830 = vmatprep.mubr.msk.f32.mxu0 %vm56_vm1, %v1066_v43 }
0x104c   :  { %1923 = vmatprep.subr.bf16.mxu0 %v1922_v41 }
0x104f   :  { %1925 = vmatpush3.bf16.msra.mxu0 %v1922_v41 }
0x1051   :  { %v1071_v48 = vld [vmem:[#allocation3 + $0x28] sm:$0xff] }
0x1052   :  { %1831 = vmatmul.mubr.msk.f32.vlgmr.msra.gmra.mrb[14].mxu0 %vm56_vm1, %v1067_v44  ;;  %v1219_v29 = vmul.f32 %v1071_v48, %v1071_v48 }
0x1053   :  { %1833 = vmatprep.mubr.msk.f32.mxu0 %vm56_vm1, %v1068_v45 }
0x1056   :  { %1834 = vmatmul.mubr.msk.f32.gmra.mrb[16].mxu0 %vm56_vm1, %v1069_v46 }
0x1057   :  { %1836 = vmatprep.mubr.msk.f32.mxu0 %vm56_vm1, %v1070_v47 }
0x105a   :  { %1837 = vmatmul.mubr.msk.f32.gmra.mrb[18].mxu0 %vm56_vm1, %v1071_v48 }
0x111d   :  { %v922_v49 = vpop.f32.mrb[12].mxu0 }
0x111e   :  { %v933_v50 = vadd.f32 %v922_v49, %v2212_v18  ;;  %v1810_v51 = vpop.f32.mrb[13].mxu0  ;;  %v926_v59 = vadd.f32 %v922_v49, %v178_v58 }
0x1120   :  { %935 = vrot.lane.b32.xlu0 %v933_v50, %s2087_s4  ;;  %v1601_v60 = vmul.f32 -1.442695, %v926_v59 }
0x1122   :  { %1976 = vpow2.f32 %v1601_v60 }
0x1125   :  { %v2351_v52 = vpop.f32.mrb[14].mxu0 }
0x1126   :  { %v2353_v53 = vpop.f32.mrb[15].mxu0 }
0x1129   :  { %v2355_v54 = vpop.f32.mrb[16].mxu0 }
0x112a   :  { %v2357_v55 = vpop.f32.mrb[17].mxu0 }
0x112c   :  { %v1977_v61 = vpop.eup %1976 }
0x112d   :  { %v2359_v56 = vpop.f32.mrb[18].mxu0  ;;  %v930_v62 = vadd.f32 1.0, %v1977_v61 }
0x112e   :  { %v2361_v57 = vpop.f32.mrb[19].mxu0 }
0x112f   :  { %1978 = vrcp.f32 %v930_v62 }
0x1139   :  { %v1979_v63 = vpop.eup %1978 }
0x113a   :  { %v945_v14 = vsub.f32 1.0, %v1979_v63  ;;  %v951_v10 = vmul.f32 %v1979_v63, %v845_v38 }
0x1192   :  { %v936_v1 = vpop.permute.xlu0 %935 }
0x1193   :  { %v938_v2 = vmul.f32 %v1979_v63, %v936_v1 }
0x1195   :  { %940 = vrot.lane.b32.xlu1 %v938_v2, %s2087_s4 }
0x1207   :  { %v941_v3 = vpop.permute.xlu1 %940 }
0x1208   :  { %v943_v5 = vadd.f32 %v941_v3, %v178_v58 }
0x120a   :  { %1980 = vtanh.f32 %v943_v5 }
0x1214   :  { %v1981_v13 = vpop.eup %1980 }
0x1215   :  { %947 = vrot.lane.b32.xlu0 %v1981_v13, %s2089_s22 }
0x1287   :  { %v948_v16 = vpop.permute.xlu0 %947 }
0x1288   :  { %v950_v17 = vmul.f32 %v948_v16, %v945_v14 }
0x128a   :  { %v2373_v19 = vadd.f32 %v951_v10, %v950_v17 }
0x128c   :  { %954 = vrot.lane.b32.xlu1 %v2373_v19, %s2089_s22 }
0x12fe   :  { %v955_v25 = vpop.permute.xlu1 %954 }
0x12ff   :  { %958 = vst.msk [vmem:[#allocation3 + $0x30] sm:$0xff] %vm56_vm1, %v955_v25  ;;  %1820 = vmatmul.mubr.msk.f32.vlgmr.msra.gmra.mrb[8].mxu1 %vm56_vm1, %v955_v25 }
0x1300   :  { %1929 = vmatpush3.bf16.msra.mxu1 %v1926_v7  ;;  %1850 = vmatprep.mubr.msk.f32.mxu1 %vm56_vm1, %v1214_v23 }
0x1301   :  { %1931 = vmatprep.subr.bf16.mxu1 %v1930_v22 }
0x1304   :  { %1933 = vmatpush3.bf16.msra.mxu1 %v1930_v22 }
0x1306   :  { %v1072_v9 = vld [vmem:[#allocation3 + $0x30] sm:$0xff] }
0x1307   :  { %1851 = vmatmul.mubr.msk.f32.vlgmr.msra.gmra.mrb[10].mxu1 %vm56_vm1, %v1215_v26  ;;  %1839 = vmatprep.mubr.msk.f32.mxu0 %vm56_vm1, %v1072_v9  ;;  %v1220_v0 = vmul.f32 %v1072_v9, %v1072_v9 }
0x1308   :  { %1853 = vmatprep.mubr.msk.f32.mxu1 %vm56_vm1, %v1216_v27 }
0x130b   :  { %1854 = vmatmul.mubr.msk.f32.gmra.mrb[12].mxu1 %vm56_vm1, %v1217_v28 }
0x130c   :  { %1856 = vmatprep.mubr.msk.f32.mxu1 %vm56_vm1, %v1218_v4 }
0x130f   :  { %1857 = vmatmul.mubr.msk.f32.gmra.mrb[14].mxu1 %vm56_vm1, %v1219_v29 }
0x1310   :  { %1859 = vmatprep.mubr.msk.f32.mxu1 %vm56_vm1, %v1220_v0 }
0x13d2   :  { %v2393_v15 = vpop.f32.mrb[8].mxu1 }
0x13d3   :  { %v1040_v30 = vadd.f32 %v2393_v15, %v2212_v18  ;;  %v1821_v31 = vpop.f32.mrb[9].mxu1  ;;  %v2408_v18 = vld [vmem:[%s2497_s8] ss:$0 sm:$0xff] }
0x13d4   :  { %v1181_v50 = vadd.f32 %v2351_v52, %v2408_v18  ;;  %v1176_v1 = vadd.f32 %v2408_v18, %v2353_v53  ;;  %v1191_v14 = vadd.f32 %v2355_v54, %v2408_v18  ;;  %v1186_v53 = vadd.f32 %v2408_v18, %v2357_v55 }
0x13d5   :  { %1042 = vrot.lane.b32.xlu0 %v1040_v30, %s2087_s4  ;;  %v1201_v54 = vadd.f32 %v2359_v56, %v2408_v18  ;;  %v1196_v55 = vadd.f32 %v2408_v18, %v2361_v57 }
0x13d6   :  { %v1443_v12 = vadd.f32 -0.8813736, %v1181_v50  ;;  %v1442_v21 = vadd.f32 -0.8813736, %v1176_v1  ;;  %v1445_v25 = vadd.f32 -0.8813736, %v1191_v14 }
0x13d7   :  { %v1444_v28 = vadd.f32 -0.8813736, %v1186_v53 }
0x13d8   :  { %v1451_v23 = vmul.f32 1.1715729, %v1443_v12  ;;  %v1450_v29 = vmul.f32 1.1715729, %v1442_v21 }
0x13da   :  { %v1852_v32 = vpop.f32.mrb[10].mxu1 }
0x13db   :  { %v1329_v33 = vadd.f32 %v1852_v32, %v2401_v8  ;;  %v1323_v34 = vpop.f32.mrb[11].mxu1  ;;  %v1453_v32 = vmul.f32 1.1715729, %v1445_v25 }
0x13dc   :  { %v1324_v35 = vadd.f32 %v2401_v8, %v1323_v34 }
0x13dd   :  { %v1363_v36 = vmul.f32 0.3926991, %v1329_v33  ;;  %v1459_v37 = vmul.f32 0.53901213, %v1329_v33 }
0x13de   :  { %v1362_v38 = vmul.f32 0.3926991, %v1324_v35  ;;  %v1458_v39 = vmul.f32 0.53901213, %v1324_v35  ;;  %v1855_v40 = vpop.f32.mrb[12].mxu1 }
0x13df   :  { %v1371_v41 = vadd.f32 1.0, %v1363_v36  ;;  %v1467_v42 = vadd.f32 1.0, %v1459_v37  ;;  %v1339_v43 = vadd.f32 %v1855_v40, %v2401_v8  ;;  %v1333_v44 = vpop.f32.mrb[13].mxu1  ;;  %v1447_v35 = vadd.f32 -0.8813736, %v1201_v54 }
0x13e0   :  { %v1370_v45 = vadd.f32 1.0, %v1362_v38  ;;  %v1334_v46 = vadd.f32 %v2401_v8, %v1333_v44  ;;  %v1466_v47 = vadd.f32 1.0, %v1458_v39  ;;  %v1452_v38 = vmul.f32 1.1715729, %v1444_v28 }
0x13e1   :  { %1982 = vrsqrt.f32 %v1371_v41  ;;  %v1365_v48 = vmul.f32 0.3926991, %v1339_v43  ;;  %v1461_v49 = vmul.f32 0.53901213, %v1339_v43  ;;  %v1446_v41 = vadd.f32 -0.8813736, %v1196_v55 }
0x13e2   :  { %1984 = vrsqrt.f32 %v1467_v42  ;;  %v1364_v51 = vmul.f32 0.3926991, %v1334_v46  ;;  %v1460_v58 = vmul.f32 0.53901213, %v1334_v46  ;;  %v1858_v59 = vpop.f32.mrb[14].mxu1 }
0x13e3   :  { %1986 = vrsqrt.f32 %v1370_v45  ;;  %v1373_v60 = vadd.f32 1.0, %v1365_v48  ;;  %v1469_v61 = vadd.f32 1.0, %v1461_v49  ;;  %v1349_v62 = vadd.f32 %v1858_v59, %v2401_v8  ;;  %v1343_v63 = vpop.f32.mrb[15].mxu1 }
0x13e4   :  { %v1372_v2 = vadd.f32 1.0, %v1364_v51  ;;  %v1344_v3 = vadd.f32 %v2401_v8, %v1343_v63  ;;  %1988 = vrsqrt.f32 %v1466_v47  ;;  %v1468_v5 = vadd.f32 1.0, %v1460_v58 }
0x13e5   :  { %v1367_v6 = vmul.f32 0.3926991, %v1349_v62  ;;  %v1463_v52 = vmul.f32 0.53901213, %v1349_v62  ;;  %1990 = vrsqrt.f32 %v1373_v60  ;;  %v1455_v47 = vmul.f32 1.1715729, %v1447_v35 }
0x13e6   :  { %v1366_v7 = vmul.f32 0.3926991, %v1344_v3  ;;  %v1462_v13 = vmul.f32 0.53901213, %v1344_v3  ;;  %1992 = vrsqrt.f32 %v1469_v61  ;;  %v1454_v60 = vmul.f32 1.1715729, %v1446_v41 }
0x13e7   :  { %v1375_v16 = vadd.f32 1.0, %v1367_v6  ;;  %v1471_v10 = vadd.f32 1.0, %v1463_v52  ;;  %1994 = vrsqrt.f32 %v1372_v2 }
0x13e8   :  { %v1374_v17 = vadd.f32 1.0, %v1366_v7  ;;  %1996 = vrsqrt.f32 %v1468_v5  ;;  %v1470_v20 = vadd.f32 1.0, %v1462_v13 }
0x13e9   :  { %1998 = vrsqrt.f32 %v1375_v16 }
0x13ea   :  { %2000 = vrsqrt.f32 %v1471_v10 }
0x13eb   :  { %v1983_v22 = vpop.eup %1982  ;;  %2002 = vrsqrt.f32 %v1374_v17 }
0x13ec   :  { %v1985_v26 = vpop.eup %1984  ;;  %v1387_v27 = vmul.f32 %v1983_v22, %v1181_v50  ;;  %2004 = vrsqrt.f32 %v1470_v20 }
0x13ed   :  { %v1987_v9 = vpop.eup %1986  ;;  %v1483_v4 = vmul.f32 %v1985_v26, %v1451_v23 }
0x13ee   :  { %v1623_v0 = vmul.f32 -1.442695, %v1387_v27  ;;  %v1386_v30 = vmul.f32 %v1987_v9, %v1176_v1  ;;  %v1989_v31 = vpop.eup %1988 }
0x13ef   :  { %v1631_v33 = vmul.f32 -1.442695, %v1483_v4  ;;  %v1991_v34 = vpop.eup %1990  ;;  %v1482_v56 = vmul.f32 %v1989_v31, %v1450_v29 }
0x13f0   :  { %2006 = vpow2.f32 %v1623_v0  ;;  %v1622_v36 = vmul.f32 -1.442695, %v1386_v30  ;;  %v1993_v37 = vpop.eup %1992  ;;  %v1389_v39 = vmul.f32 %v1991_v34, %v1191_v14 }
0x13f1   :  { %2008 = vpow2.f32 %v1631_v33  ;;  %v1995_v40 = vpop.eup %1994  ;;  %v1630_v42 = vmul.f32 -1.442695, %v1482_v56  ;;  %v1485_v43 = vmul.f32 %v1993_v37, %v1453_v32 }
0x13f2   :  { %2010 = vpow2.f32 %v1622_v36  ;;  %v1997_v57 = vpop.eup %1996  ;;  %v1625_v44 = vmul.f32 -1.442695, %v1389_v39  ;;  %v1388_v45 = vmul.f32 %v1995_v40, %v1186_v53 }
0x13f3   :  { %v1999_v46 = vpop.eup %1998  ;;  %2012 = vpow2.f32 %v1630_v42  ;;  %v1633_v48 = vmul.f32 -1.442695, %v1485_v43  ;;  %v1484_v49 = vmul.f32 %v1997_v57, %v1452_v38 }
0x13f4   :  { %v2001_v50 = vpop.eup %2000  ;;  %2014 = vpow2.f32 %v1625_v44  ;;  %v1624_v51 = vmul.f32 -1.442695, %v1388_v45  ;;  %v1391_v58 = vmul.f32 %v1999_v46, %v1201_v54 }
0x13f5   :  { %v2003_v59 = vpop.eup %2002  ;;  %2016 = vpow2.f32 %v1633_v48  ;;  %v1632_v61 = vmul.f32 -1.442695, %v1484_v49  ;;  %v1487_v62 = vmul.f32 %v2001_v50, %v1455_v47 }
0x13f6   :  { %v2005_v63 = vpop.eup %2004  ;;  %2018 = vpow2.f32 %v1624_v51  ;;  %v1627_v1 = vmul.f32 -1.442695, %v1391_v58  ;;  %v1390_v2 = vmul.f32 %v2003_v59, %v1196_v55 }
0x13f7   :  { %2020 = vpow2.f32 %v1632_v61  ;;  %v1635_v3 = vmul.f32 -1.442695, %v1487_v62  ;;  %v1486_v5 = vmul.f32 %v2005_v63, %v1454_v60  ;;  %v183_v60 = vadd.f32 %v2269_v11, %v2219_v24 }
0x13f8   :  { %2022 = vpow2.f32 %v1627_v1  ;;  %v1626_v6 = vmul.f32 -1.442695, %v1390_v2 }
0x13f9   :  { %2024 = vpow2.f32 %v1635_v3  ;;  %v1634_v12 = vmul.f32 -1.442695, %v1486_v5  ;;  %v1033_v61 = vadd.f32 %v2393_v15, %v183_v60 }
0x13fa   :  { %v2007_v52 = vpop.eup %2006  ;;  %2026 = vpow2.f32 %v1626_v6 }
0x13fb   :  { %v2009_v7 = vpop.eup %2008  ;;  %v1419_v13 = vadd.f32 1.0, %v2007_v52  ;;  %2028 = vpow2.f32 %v1634_v12  ;;  %v1603_v62 = vmul.f32 -1.442695, %v1033_v61 }
0x13fc   :  { %v2011_v14 = vpop.eup %2010  ;;  %v1515_v16 = vadd.f32 1.0, %v2009_v7 }
0x13fd   :  { %2030 = vrcp.f32 %v1419_v13  ;;  %v1418_v10 = vadd.f32 1.0, %v2011_v14  ;;  %v2013_v17 = vpop.eup %2012 }
0x13fe   :  { %2032 = vrcp.f32 %v1515_v16  ;;  %v2015_v53 = vpop.eup %2014  ;;  %v1514_v20 = vadd.f32 1.0, %v2013_v17 }
0x13ff   :  { %2034 = vrcp.f32 %v1418_v10  ;;  %v2017_v21 = vpop.eup %2016  ;;  %v1421_v22 = vadd.f32 1.0, %v2015_v53 }
0x1400   :  { %v2019_v23 = vpop.eup %2018  ;;  %2036 = vrcp.f32 %v1514_v20  ;;  %v1517_v25 = vadd.f32 1.0, %v2017_v21 }
0x1401   :  { %v2021_v26 = vpop.eup %2020  ;;  %2038 = vrcp.f32 %v1421_v22  ;;  %v1420_v54 = vadd.f32 1.0, %v2019_v23 }
0x1402   :  { %v2023_v27 = vpop.eup %2022  ;;  %2040 = vrcp.f32 %v1517_v25  ;;  %v1516_v9 = vadd.f32 1.0, %v2021_v26 }
0x1403   :  { %v2025_v28 = vpop.eup %2024  ;;  %2042 = vrcp.f32 %v1420_v54  ;;  %v1423_v4 = vadd.f32 1.0, %v2023_v27 }
0x1404   :  { %v2027_v29 = vpop.eup %2026  ;;  %2044 = vrcp.f32 %v1516_v9  ;;  %v1519_v55 = vadd.f32 1.0, %v2025_v28 }
0x1405   :  { %v2029_v0 = vpop.eup %2028  ;;  %2046 = vrcp.f32 %v1423_v4  ;;  %v1422_v30 = vadd.f32 1.0, %v2027_v29 }
0x1406   :  { %2048 = vrcp.f32 %v1519_v55  ;;  %v1518_v32 = vadd.f32 1.0, %v2029_v0 }
0x1407   :  { %v2031_v31 = vpop.eup %2030  ;;  %2050 = vrcp.f32 %v1422_v30 }
0x1408   :  { %v2033_v33 = vpop.eup %2032  ;;  %v1539_v34 = vmul.f32 %v2031_v31, %v2031_v31  ;;  %1555 = vst [vmem:[%s2498_s10 + $0x8] sm:$0xff] %v2031_v31  ;;  %2052 = vrcp.f32 %v1518_v32 }
0x1409   :  { %v2035_v35 = vpop.eup %2034  ;;  %2054 = vpow2.f32 %v1603_v62 }
0x140a   :  { %v1547_v36 = vsub.f32 %v2033_v33, %v1539_v34  ;;  %v1538_v56 = vmul.f32 %v2035_v35, %v2035_v35  ;;  %1554 = vst [vmem:[%s2498_s10] sm:$0xff] %v2035_v35  ;;  %v2037_v37 = vpop.eup %2036 }
0x140b   :  { %v2039_v38 = vpop.eup %2038 }
0x140c   :  { %1563 = vst [vmem:[%s2499_s11 + $0x8] sm:$0xff] %v1547_v36  ;;  %v1546_v39 = vsub.f32 %v2037_v37, %v1538_v56  ;;  %v2041_v40 = vpop.eup %2040  ;;  %v1541_v41 = vmul.f32 %v2039_v38, %v2039_v38  ;;  %1557 = vst [vmem:[%s2498_s10 + $0x18] sm:$0xff] %v2039_v38 }
0x140d   :  { %v2043_v42 = vpop.eup %2042 }
0x140e   :  { %1562 = vst [vmem:[%s2499_s11] sm:$0xff] %v1546_v39  ;;  %v2045_v43 = vpop.eup %2044  ;;  %v1549_v57 = vsub.f32 %v2041_v40, %v1541_v41  ;;  %v1540_v44 = vmul.f32 %v2043_v42, %v2043_v42  ;;  %1556 = vst [vmem:[%s2498_s10 + $0x10] sm:$0xff] %v2043_v42 }
0x140f   :  { %v2047_v45 = vpop.eup %2046 }
0x1410   :  { %v2049_v46 = vpop.eup %2048  ;;  %1565 = vst [vmem:[%s2499_s11 + $0x18] sm:$0xff] %v1549_v57  ;;  %v1548_v47 = vsub.f32 %v2045_v43, %v1540_v44  ;;  %v1543_v48 = vmul.f32 %v2047_v45, %v2047_v45  ;;  %1559 = vst [vmem:[%s2498_s10 + $0x28] sm:$0xff] %v2047_v45 }
0x1411   :  { %v2051_v49 = vpop.eup %2050 }
0x1412   :  { %1564 = vst [vmem:[%s2499_s11 + $0x10] sm:$0xff] %v1548_v47  ;;  %v1551_v50 = vsub.f32 %v2049_v46, %v1543_v48  ;;  %v1542_v51 = vmul.f32 %v2051_v49, %v2051_v49  ;;  %1558 = vst [vmem:[%s2498_s10 + $0x20] sm:$0xff] %v2051_v49  ;;  %v2053_v58 = vpop.eup %2052 }
0x1413   :  { %v2055_v63 = vpop.eup %2054 }
0x1414   :  { %1567 = vst [vmem:[%s2499_s11 + $0x28] sm:$0xff] %v1551_v50  ;;  %v1550_v59 = vsub.f32 %v2053_v58, %v1542_v51  ;;  %v1037_v1 = vadd.f32 1.0, %v2055_v63 }
0x1416   :  { %1566 = vst [vmem:[%s2499_s11 + $0x20] sm:$0xff] %v1550_v59  ;;  %2056 = vrcp.f32 %v1037_v1 }
0x1420   :  { %v2057_v2 = vpop.eup %2056 }
0x1421   :  { %v1052_v7 = vsub.f32 1.0, %v2057_v2  ;;  %v1058_v11 = vmul.f32 %v2057_v2, %v2373_v19 }
0x1447   :  { %v1043_v3 = vpop.permute.xlu0 %1042 }
0x1448   :  { %v1045_v5 = vmul.f32 %v2057_v2, %v1043_v3 }
0x144a   :  { %1047 = vrot.lane.b32.xlu1 %v1045_v5, %s2087_s4 }
0x14bc   :  { %v1048_v6 = vpop.permute.xlu1 %1047 }
0x14bd   :  { %v1050_v52 = vadd.f32 %v1048_v6, %v183_v60 }
0x14bf   :  { %2058 = vtanh.f32 %v1050_v52 }
0x14c9   :  { %v2059_v12 = vpop.eup %2058 }
0x14ca   :  { %1054 = vrot.lane.b32.xlu0 %v2059_v12, %s2089_s22 }
0x153c   :  { %v1055_v24 = vpop.permute.xlu0 %1054 }
0x153d   :  { %v1057_v15 = vmul.f32 %v1055_v24, %v1052_v7 }
0x153f   :  { %v1059_v13 = vadd.f32 %v1058_v11, %v1057_v15 }
0x1541   :  { %1061 = vrot.lane.b32.xlu1 %v1059_v13, %s2089_s22 }
0x15b3   :  { %v1062_v14 = vpop.permute.xlu1 %1061 }
0x15b4   :  { %1065 = vst.msk [vmem:[#allocation3 + $0x38] sm:$0xff] %vm56_vm1, %v1062_v14 }
0x15bb   :  { %v1073_v16 = vld [vmem:[#allocation3 + $0x38] sm:$0xff] }
0x15bc   :  { %1840 = vmatmul.mubr.msk.f32.gmra.mrb[20].mxu0 %vm56_vm1, %v1073_v16  ;;  %v1221_v10 = vmul.f32 %v1073_v16, %v1073_v16 }
0x15be   :  { %1860 = vmatmul.mubr.msk.f32.gmra.mrb[16].mxu1 %vm56_vm1, %v1221_v10 }
0x168f   :  { %v1841_v17 = vpop.f32.mrb[20].mxu0 }
0x1690   :  { %v1205_v53 = vpop.f32.mrb[21].mxu0  ;;  %v1211_v29 = vadd.f32 %v1841_v17, %v2408_v18 }
0x1691   :  { %v1861_v20 = vpop.f32.mrb[16].mxu1  ;;  %v1206_v55 = vadd.f32 %v2408_v18, %v1205_v53 }
0x1692   :  { %v1359_v21 = vadd.f32 %v1861_v20, %v2401_v8  ;;  %v1353_v22 = vpop.f32.mrb[17].mxu1  ;;  %v1449_v0 = vadd.f32 -0.8813736, %v1211_v29 }
0x1693   :  { %v1354_v19 = vadd.f32 %v2401_v8, %v1353_v22  ;;  %v1448_v30 = vadd.f32 -0.8813736, %v1206_v55 }
0x1694   :  { %v1369_v23 = vmul.f32 0.3926991, %v1359_v21  ;;  %v1465_v25 = vmul.f32 0.53901213, %v1359_v21  ;;  %v1457_v8 = vmul.f32 1.1715729, %v1449_v0 }
0x1695   :  { %v1368_v26 = vmul.f32 0.3926991, %v1354_v19  ;;  %v1464_v54 = vmul.f32 0.53901213, %v1354_v19  ;;  %v1456_v35 = vmul.f32 1.1715729, %v1448_v30 }
0x1696   :  { %v1377_v27 = vadd.f32 1.0, %v1369_v23  ;;  %v1473_v9 = vadd.f32 1.0, %v1465_v25 }
0x1697   :  { %v1376_v28 = vadd.f32 1.0, %v1368_v26  ;;  %v1472_v4 = vadd.f32 1.0, %v1464_v54 }
0x1698   :  { %2060 = vrsqrt.f32 %v1377_v27 }
0x1699   :  { %2062 = vrsqrt.f32 %v1473_v9 }
0x169a   :  { %2064 = vrsqrt.f32 %v1376_v28 }
0x169b   :  { %2066 = vrsqrt.f32 %v1472_v4 }
0x16a2   :  { %v2061_v31 = vpop.eup %2060 }
0x16a3   :  { %v2063_v32 = vpop.eup %2062  ;;  %v1393_v33 = vmul.f32 %v2061_v31, %v1211_v29 }
0x16a4   :  { %v2065_v34 = vpop.eup %2064  ;;  %v1489_v36 = vmul.f32 %v2063_v32, %v1457_v8 }
0x16a5   :  { %v2067_v56 = vpop.eup %2066  ;;  %v1629_v37 = vmul.f32 -1.442695, %v1393_v33  ;;  %v1392_v38 = vmul.f32 %v2065_v34, %v1206_v55 }
0x16a6   :  { %v1637_v39 = vmul.f32 -1.442695, %v1489_v36  ;;  %v1488_v40 = vmul.f32 %v2067_v56, %v1456_v35 }
0x16a7   :  { %2068 = vpow2.f32 %v1629_v37  ;;  %v1628_v41 = vmul.f32 -1.442695, %v1392_v38 }
0x16a8   :  { %2070 = vpow2.f32 %v1637_v39  ;;  %v1636_v42 = vmul.f32 -1.442695, %v1488_v40 }
0x16a9   :  { %2072 = vpow2.f32 %v1628_v41 }
0x16aa   :  { %2074 = vpow2.f32 %v1636_v42 }
0x16b1   :  { %v2069_v18 = vpop.eup %2068 }
0x16b2   :  { %v2071_v43 = vpop.eup %2070  ;;  %v1425_v57 = vadd.f32 1.0, %v2069_v18 }
0x16b3   :  { %v2073_v44 = vpop.eup %2072  ;;  %v1521_v45 = vadd.f32 1.0, %v2071_v43 }
0x16b4   :  { %v2075_v46 = vpop.eup %2074  ;;  %2076 = vrcp.f32 %v1425_v57  ;;  %v1424_v47 = vadd.f32 1.0, %v2073_v44 }
0x16b5   :  { %2078 = vrcp.f32 %v1521_v45  ;;  %v1520_v48 = vadd.f32 1.0, %v2075_v46 }
0x16b6   :  { %2080 = vrcp.f32 %v1424_v47 }
0x16b7   :  { %2082 = vrcp.f32 %v1520_v48 }
0x16be   :  { %v2077_v49 = vpop.eup %2076 }
0x16bf   :  { %v2079_v50 = vpop.eup %2078  ;;  %v1545_v51 = vmul.f32 %v2077_v49, %v2077_v49  ;;  %1561 = vst [vmem:[%s2498_s10 + $0x38] sm:$0xff] %v2077_v49 }
0x16c0   :  { %v2081_v58 = vpop.eup %2080 }
0x16c1   :  { %v1553_v59 = vsub.f32 %v2079_v50, %v1545_v51  ;;  %v1544_v60 = vmul.f32 %v2081_v58, %v2081_v58  ;;  %1560 = vst [vmem:[%s2498_s10 + $0x30] sm:$0xff] %v2081_v58  ;;  %v2083_v61 = vpop.eup %2082 }
0x16c3   :  { %1569 = vst [vmem:[%s2499_s11 + $0x38] sm:$0xff] %v1553_v59  ;;  %v1552_v62 = vsub.f32 %v2083_v61, %v1544_v60 }
0x16c5   :  { %1568 = vst [vmem:[%s2499_s11 + $0x30] sm:$0xff] %v1552_v62 }

</bundles_post_ra>
